<compile_context>
chip_gen: v7x
topology: tpu7x:2x2x1
jax: 0.10.0
libtpu: 0.0.40
codegen_flags: <defaults>
</compile_context>

<pallas_src>
import math

import jax
import jax.numpy as jnp
from jax.experimental import pallas as pl
from jax.experimental.pallas import tpu as pltpu


# --------------------------------------------------------------------------- #
# Host-side, one-time parameter lowering                                       #
# --------------------------------------------------------------------------- #

def _band_conv_weights(w, iw):
    """Lower a (Cout, Cin, KH, KW) conv weight to a banded GEMM matrix.

    Returns B of shape (KH*Cin*IW, 2*Cout*(OW//2)) such that, with
        A[oh, kh*Cin*IW + cin*IW + i] = x[cin, oh + kh, i],
    A @ B is the valid (stride-1) conv output with columns ordered
        n = (ow % 2) * Cout*(OW//2) + cout*(OW//2) + ow//2 ,
    i.e. even-/odd-ow columns land in separate halves so the width half of the
    2x2 max-pool is a max of the two column halves.
    """
    cout, cin, kh, kw = w.shape
    ow = iw - kw + 1
    ow2 = ow // 2
    i_idx = jnp.arange(iw)[:, None]                      # (IW, 1)
    o_idx = jnp.arange(ow)[None, :]                      # (1, OW)
    k_idx = i_idx - o_idx                                # (IW, OW)  = kw offset
    valid = ((k_idx >= 0) & (k_idx < kw)).astype(w.dtype)
    k_idx = jnp.clip(k_idx, 0, kw - 1)
    wt = jnp.transpose(w, (2, 1, 0, 3))                  # (KH, Cin, Cout, KW)
    t = wt[:, :, :, k_idx] * valid                       # (KH, Cin, Cout, IW, OW)
    t = jnp.transpose(t, (0, 1, 3, 4, 2))                # (KH, Cin, IW, OW, Cout)
    t = t.reshape(kh, cin, iw, ow2, 2, cout)             # ow -> (ow//2, ow%2)
    t = jnp.transpose(t, (0, 1, 2, 4, 5, 3))             # (KH, Cin, IW, 2, Cout, OW2)
    return t.reshape(kh * cin * iw, 2 * cout * ow2)


def _band_conv_bias(b, ow):
    cout = b.shape[0]
    return jnp.broadcast_to(b[None, :, None], (2, cout, ow // 2)).reshape(1, -1)


def _pool_selectors(n):
    """(n, 2n) 0/1 matrices that select even / odd rows (height half of 2x2 pool)."""
    rows = jnp.arange(n)[:, None]
    cols = jnp.arange(2 * n)[None, :]
    even = (cols == 2 * rows).astype(jnp.float32)
    odd = (cols == 2 * rows + 1).astype(jnp.float32)
    return even, odd


def prepare_params(params):
    """One-time host-side lowering of the torch-layout parameters."""
    p1e, p1o = _pool_selectors(14)
    p2e, p2o = _pool_selectors(5)
    # fc1 weight, regrouped to match the kernel's pooled layout p2[h, c*5 + w]:
    fw1 = params["fc1_w"].reshape(120, 16, 5, 5)          # (o, c, h, w)
    fw1 = jnp.transpose(fw1, (2, 1, 3, 0)).reshape(5, 16 * 5, 120)
    return {
        "w1": _band_conv_weights(params["conv1_w"], iw=32),   # (480, 168)
        "b1": _band_conv_bias(params["conv1_b"], ow=28),      # (1, 168)
        "p1e": p1e, "p1o": p1o,                               # (14, 28)
        "w2": _band_conv_weights(params["conv2_w"], iw=14),   # (420, 160)
        "b2": _band_conv_bias(params["conv2_b"], ow=10),      # (1, 160)
        "p2e": p2e, "p2o": p2o,                               # (5, 10)
        "fw1": fw1,                                           # (5, 80, 120)
        "fb1": params["fc1_b"].reshape(1, 120),
        "fw2": params["fc2_w"].T,                             # (120, 84)
        "fb2": params["fc2_b"].reshape(1, 84),
        "fw3": params["fc3_w"].T,                             # (84, 10)
        "fb3": params["fc3_b"].reshape(1, 10),
    }


# --------------------------------------------------------------------------- #
# Fused Pallas kernel: one image per grid step, everything stays in VMEM       #
# --------------------------------------------------------------------------- #

def _lenet_kernel(x_ref, w1_ref, b1_ref, p1e_ref, p1o_ref,
                  w2_ref, b2_ref, p2e_ref, p2o_ref,
                  fw1_ref, fb1_ref, fw2_ref, fb2_ref, fw3_ref, fb3_ref,
                  out_ref):
    f32 = jnp.float32
    x = x_ref[0]                                           # (3, 32, 32)

    # ---- conv1 (banded GEMM) + bias + ReLU -------------------------------
    # in-kernel "im2col": 15 shifted slices concatenated along lanes.
    a1 = jnp.concatenate(
        [x[c, kh:kh + 28, :] for kh in range(5) for c in range(3)], axis=-1)
    h1 = jnp.dot(a1, w1_ref[...], preferred_element_type=f32) + b1_ref[...]
    h1 = jnp.maximum(h1, 0.0)                              # (28, 168)

    # ---- 2x2 max-pool #1 ---------------------------------------------------
    h1 = jnp.maximum(h1[:, :84], h1[:, 84:])               # width pool -> (28, 84)
    p1 = jnp.maximum(
        jnp.dot(p1e_ref[...], h1, preferred_element_type=f32),
        jnp.dot(p1o_ref[...], h1, preferred_element_type=f32))  # (14, 84) = (h, c*14+w)

    # ---- conv2 (banded GEMM) + bias + ReLU -------------------------------
    a2 = jnp.concatenate(
        [p1[kh:kh + 10, c * 14:(c + 1) * 14]
         for kh in range(5) for c in range(6)], axis=-1)   # (10, 420)
    h2 = jnp.dot(a2, w2_ref[...], preferred_element_type=f32) + b2_ref[...]
    h2 = jnp.maximum(h2, 0.0)                              # (10, 160)

    # ---- 2x2 max-pool #2 ---------------------------------------------------
    h2 = jnp.maximum(h2[:, :80], h2[:, 80:])               # (10, 80)
    p2 = jnp.maximum(
        jnp.dot(p2e_ref[...], h2, preferred_element_type=f32),
        jnp.dot(p2o_ref[...], h2, preferred_element_type=f32))  # (5, 80) = (h, c*5+w)

    # ---- fc1 as 5 accumulated row-block dots (no in-kernel flatten) -------
    z = jnp.dot(p2[0:1, :], fw1_ref[0], preferred_element_type=f32)
    for h in range(1, 5):
        z = z + jnp.dot(p2[h:h + 1, :], fw1_ref[h], preferred_element_type=f32)
    z = jnp.maximum(z + fb1_ref[...], 0.0)                 # (1, 120)

    # ---- fc2 / fc3 ----------------------------------------------------------
    z = jnp.maximum(
        jnp.dot(z, fw2_ref[...], preferred_element_type=f32) + fb2_ref[...], 0.0)
    z = jnp.dot(z, fw3_ref[...], preferred_element_type=f32) + fb3_ref[...]   # (1, 10)

    out_ref[...] = z[None].astype(out_ref.dtype)           # (1, 1, 10)


def _const_spec(a):
    """Full-array block with a constant index_map: stays resident in VMEM."""
    if a.ndim == 2:
        return pl.BlockSpec(a.shape, lambda i: (0, 0))
    return pl.BlockSpec(a.shape, lambda i: (0, 0, 0))


@jax.jit
def net_forward(prep, x):
    """Forward of the PyTorch Net. x: (B, 3, 32, 32) f32 -> (B, 10) f32."""
    B = x.shape[0]
    names = ("w1", "b1", "p1e", "p1o", "w2", "b2", "p2e", "p2o",
             "fw1", "fb1", "fw2", "fb2", "fw3", "fb3")
    consts = [prep[n] for n in names]

    out = pl.pallas_call(
        _lenet_kernel,
        out_shape=jax.ShapeDtypeStruct((B, 1, 10), jnp.float32),
        grid=(B,),
        in_specs=[pl.BlockSpec((1, 3, 32, 32), lambda i: (i, 0, 0, 0))]
                 + [_const_spec(a) for a in consts],
        out_specs=pl.BlockSpec((1, 1, 10), lambda i: (i, 0, 0)),
        compiler_params=pltpu.CompilerParams(
            dimension_semantics=("parallel",)),
    )(x, *consts)
    return out.reshape(B, 10)


# --------------------------------------------------------------------------- #
# Pure-JAX reference (uses the original torch-layout params)                   #
# --------------------------------------------------------------------------- #

def net_forward_ref(params, x):
    dn = ("NCHW", "OIHW", "NCHW")

    def conv(x, w, b):
        y = jax.lax.conv_general_dilated(x, w, (1, 1), "VALID", dimension_numbers=dn)
        return jnp.maximum(y + b.reshape(1, -1, 1, 1), 0.0)

    def pool(x):
        return jax.lax.reduce_window(x, -jnp.inf, jax.lax.max,
                                     (1, 1, 2, 2), (1, 1, 2, 2), "VALID")

    x = pool(conv(x, params["conv1_w"], params["conv1_b"]))
    x = pool(conv(x, params["conv2_w"], params["conv2_b"]))
    x = x.reshape(-1, 16 * 5 * 5)
    x = jnp.maximum(x @ params["fc1_w"].T + params["fc1_b"], 0.0)
    x = jnp.maximum(x @ params["fc2_w"].T + params["fc2_b"], 0.0)
    return x @ params["fc3_w"].T + params["fc3_b"]


# --------------------------------------------------------------------------- #
# Main                                                                          #
# --------------------------------------------------------------------------- #

def init_params(key):
    """Deterministic PyTorch-default-style uniform init (U[-1/sqrt(fan_in), ...])."""
    ks = jax.random.split(key, 10)

    def u(k, shape, fan_in):
        bound = 1.0 / math.sqrt(fan_in)
        return jax.random.uniform(k, shape, jnp.float32, -bound, bound)

    return {
        "conv1_w": u(ks[0], (6, 3, 5, 5), 3 * 5 * 5),
        "conv1_b": u(ks[1], (6,), 3 * 5 * 5),
        "conv2_w": u(ks[2], (16, 6, 5, 5), 6 * 5 * 5),
        "conv2_b": u(ks[3], (16,), 6 * 5 * 5),
        "fc1_w": u(ks[4], (120, 400), 400),   # torch Linear weight: (out, in)
        "fc1_b": u(ks[5], (120,), 400),
        "fc2_w": u(ks[6], (84, 120), 120),
        "fc2_b": u(ks[7], (84,), 120),
        "fc3_w": u(ks[8], (10, 84), 84),
        "fc3_b": u(ks[9], (10,), 84),
    }


if __name__ == "__main__":
    root = jax.random.PRNGKey(0)
    pkey, xkey = jax.random.split(root)
    params = init_params(pkey)
    prep = prepare_params(params)   # one-time host-side weight lowering

    # CIFAR-shaped input (3x32x32 is forced by the fixed 16*5*5 flatten).
    x = jax.random.normal(xkey, (8, 3, 32, 32), jnp.float32)

    out = jax.block_until_ready(net_forward(prep, x))
    assert out.shape == (8, 10) and out.dtype == jnp.float32

    ref = jax.block_until_ready(net_forward_ref(params, x))
    assert jnp.allclose(out, ref, atol=5e-4, rtol=5e-4), "mismatch vs JAX reference"

    print("KERNEL_OK")
</pallas_src>

<mosaic_0001>
module attributes {stable_mosaic.version = 11 : i64} {
  func.func @_lenet_kernel(%arg0: i32, %arg1: memref<1x3x32x32xf32, #tpu.memory_space<vmem>>, %arg2: memref<480x168xf32, #tpu.memory_space<vmem>>, %arg3: memref<1x168xf32, #tpu.memory_space<vmem>>, %arg4: memref<14x28xf32, #tpu.memory_space<vmem>>, %arg5: memref<14x28xf32, #tpu.memory_space<vmem>>, %arg6: memref<420x160xf32, #tpu.memory_space<vmem>>, %arg7: memref<1x160xf32, #tpu.memory_space<vmem>>, %arg8: memref<5x10xf32, #tpu.memory_space<vmem>>, %arg9: memref<5x10xf32, #tpu.memory_space<vmem>>, %arg10: memref<5x80x120xf32, #tpu.memory_space<vmem>>, %arg11: memref<1x120xf32, #tpu.memory_space<vmem>>, %arg12: memref<120x84xf32, #tpu.memory_space<vmem>>, %arg13: memref<1x84xf32, #tpu.memory_space<vmem>>, %arg14: memref<84x10xf32, #tpu.memory_space<vmem>>, %arg15: memref<1x10xf32, #tpu.memory_space<vmem>>, %arg16: memref<1x1x10xf32, #tpu.memory_space<vmem>>) attributes {dimension_semantics = [#tpu.dimension_semantics<parallel>], iteration_bounds = array<i64: 8>, scalar_prefetch = 0 : i64, scratch_operands = 0 : i64, tpu.core_type = #tpu.core_type<tc>, window_params = [{transform_indices = @transform_0, window_bounds = array<i64: 1, 3, 32, 32>}, {pipeline_mode = #tpu.pipeline_mode<synchronous>, transform_indices = @transform_1, window_bounds = array<i64: 480, 168>}, {pipeline_mode = #tpu.pipeline_mode<synchronous>, transform_indices = @transform_2, window_bounds = array<i64: 1, 168>}, {pipeline_mode = #tpu.pipeline_mode<synchronous>, transform_indices = @transform_3, window_bounds = array<i64: 14, 28>}, {pipeline_mode = #tpu.pipeline_mode<synchronous>, transform_indices = @transform_4, window_bounds = array<i64: 14, 28>}, {pipeline_mode = #tpu.pipeline_mode<synchronous>, transform_indices = @transform_5, window_bounds = array<i64: 420, 160>}, {pipeline_mode = #tpu.pipeline_mode<synchronous>, transform_indices = @transform_6, window_bounds = array<i64: 1, 160>}, {pipeline_mode = #tpu.pipeline_mode<synchronous>, transform_indices = @transform_7, window_bounds = array<i64: 5, 10>}, {pipeline_mode = #tpu.pipeline_mode<synchronous>, transform_indices = @transform_8, window_bounds = array<i64: 5, 10>}, {pipeline_mode = #tpu.pipeline_mode<synchronous>, transform_indices = @transform_9, window_bounds = array<i64: 5, 80, 120>}, {pipeline_mode = #tpu.pipeline_mode<synchronous>, transform_indices = @transform_10, window_bounds = array<i64: 1, 120>}, {pipeline_mode = #tpu.pipeline_mode<synchronous>, transform_indices = @transform_11, window_bounds = array<i64: 120, 84>}, {pipeline_mode = #tpu.pipeline_mode<synchronous>, transform_indices = @transform_12, window_bounds = array<i64: 1, 84>}, {pipeline_mode = #tpu.pipeline_mode<synchronous>, transform_indices = @transform_13, window_bounds = array<i64: 84, 10>}, {pipeline_mode = #tpu.pipeline_mode<synchronous>, transform_indices = @transform_14, window_bounds = array<i64: 1, 10>}, {transform_indices = @transform_15, window_bounds = array<i64: 1, 1, 10>}]} {
    %c0 = arith.constant 0 : index
    %c0_0 = arith.constant 0 : index
    %c0_1 = arith.constant 0 : index
    %c0_2 = arith.constant 0 : index
    %0 = vector.load %arg1[%c0, %c0_0, %c0_1, %c0_2] : memref<1x3x32x32xf32, #tpu.memory_space<vmem>>, vector<1x3x32x32xf32>
    %1 = vector.shape_cast %0 : vector<1x3x32x32xf32> to vector<3x32x32xf32>
    %2 = vector.extract_strided_slice %1 {offsets = [0, 0, 0], sizes = [1, 28, 32], strides = [1, 1, 1]} : vector<3x32x32xf32> to vector<1x28x32xf32>
    %3 = vector.shape_cast %2 : vector<1x28x32xf32> to vector<28x32xf32>
    %4 = vector.extract_strided_slice %1 {offsets = [1, 0, 0], sizes = [1, 28, 32], strides = [1, 1, 1]} : vector<3x32x32xf32> to vector<1x28x32xf32>
    %5 = vector.shape_cast %4 : vector<1x28x32xf32> to vector<28x32xf32>
    %6 = vector.extract_strided_slice %1 {offsets = [2, 0, 0], sizes = [1, 28, 32], strides = [1, 1, 1]} : vector<3x32x32xf32> to vector<1x28x32xf32>
    %7 = vector.shape_cast %6 : vector<1x28x32xf32> to vector<28x32xf32>
    %8 = vector.extract_strided_slice %1 {offsets = [0, 1, 0], sizes = [1, 28, 32], strides = [1, 1, 1]} : vector<3x32x32xf32> to vector<1x28x32xf32>
    %9 = vector.shape_cast %8 : vector<1x28x32xf32> to vector<28x32xf32>
    %10 = vector.extract_strided_slice %1 {offsets = [1, 1, 0], sizes = [1, 28, 32], strides = [1, 1, 1]} : vector<3x32x32xf32> to vector<1x28x32xf32>
    %11 = vector.shape_cast %10 : vector<1x28x32xf32> to vector<28x32xf32>
    %12 = vector.extract_strided_slice %1 {offsets = [2, 1, 0], sizes = [1, 28, 32], strides = [1, 1, 1]} : vector<3x32x32xf32> to vector<1x28x32xf32>
    %13 = vector.shape_cast %12 : vector<1x28x32xf32> to vector<28x32xf32>
    %14 = vector.extract_strided_slice %1 {offsets = [0, 2, 0], sizes = [1, 28, 32], strides = [1, 1, 1]} : vector<3x32x32xf32> to vector<1x28x32xf32>
    %15 = vector.shape_cast %14 : vector<1x28x32xf32> to vector<28x32xf32>
    %16 = vector.extract_strided_slice %1 {offsets = [1, 2, 0], sizes = [1, 28, 32], strides = [1, 1, 1]} : vector<3x32x32xf32> to vector<1x28x32xf32>
    %17 = vector.shape_cast %16 : vector<1x28x32xf32> to vector<28x32xf32>
    %18 = vector.extract_strided_slice %1 {offsets = [2, 2, 0], sizes = [1, 28, 32], strides = [1, 1, 1]} : vector<3x32x32xf32> to vector<1x28x32xf32>
    %19 = vector.shape_cast %18 : vector<1x28x32xf32> to vector<28x32xf32>
    %20 = vector.extract_strided_slice %1 {offsets = [0, 3, 0], sizes = [1, 28, 32], strides = [1, 1, 1]} : vector<3x32x32xf32> to vector<1x28x32xf32>
    %21 = vector.shape_cast %20 : vector<1x28x32xf32> to vector<28x32xf32>
    %22 = vector.extract_strided_slice %1 {offsets = [1, 3, 0], sizes = [1, 28, 32], strides = [1, 1, 1]} : vector<3x32x32xf32> to vector<1x28x32xf32>
    %23 = vector.shape_cast %22 : vector<1x28x32xf32> to vector<28x32xf32>
    %24 = vector.extract_strided_slice %1 {offsets = [2, 3, 0], sizes = [1, 28, 32], strides = [1, 1, 1]} : vector<3x32x32xf32> to vector<1x28x32xf32>
    %25 = vector.shape_cast %24 : vector<1x28x32xf32> to vector<28x32xf32>
    %26 = vector.extract_strided_slice %1 {offsets = [0, 4, 0], sizes = [1, 28, 32], strides = [1, 1, 1]} : vector<3x32x32xf32> to vector<1x28x32xf32>
    %27 = vector.shape_cast %26 : vector<1x28x32xf32> to vector<28x32xf32>
    %28 = vector.extract_strided_slice %1 {offsets = [1, 4, 0], sizes = [1, 28, 32], strides = [1, 1, 1]} : vector<3x32x32xf32> to vector<1x28x32xf32>
    %29 = vector.shape_cast %28 : vector<1x28x32xf32> to vector<28x32xf32>
    %30 = vector.extract_strided_slice %1 {offsets = [2, 4, 0], sizes = [1, 28, 32], strides = [1, 1, 1]} : vector<3x32x32xf32> to vector<1x28x32xf32>
    %31 = vector.shape_cast %30 : vector<1x28x32xf32> to vector<28x32xf32>
    %32 = tpu.concatenate %3, %5, %7, %9, %11, %13, %15, %17, %19, %21, %23, %25, %27, %29, %31 in 1 : vector<28x32xf32>, vector<28x32xf32>, vector<28x32xf32>, vector<28x32xf32>, vector<28x32xf32>, vector<28x32xf32>, vector<28x32xf32>, vector<28x32xf32>, vector<28x32xf32>, vector<28x32xf32>, vector<28x32xf32>, vector<28x32xf32>, vector<28x32xf32>, vector<28x32xf32>, vector<28x32xf32> -> vector<28x480xf32>
    %c0_3 = arith.constant 0 : index
    %c0_4 = arith.constant 0 : index
    %33 = vector.load %arg2[%c0_3, %c0_4] : memref<480x168xf32, #tpu.memory_space<vmem>>, vector<480x168xf32>
    %cst = arith.constant dense<0.000000e+00> : vector<28x168xf32>
    %34 = tpu.matmul %32, %33, %cst {dimension_numbers = #tpu.dot_dimension_numbers<[1], [0], [0], [1], [0, 0, 1, 1], [], []>} : vector<28x480xf32>, vector<480x168xf32>, vector<28x168xf32> -> vector<28x168xf32>
    %c0_5 = arith.constant 0 : index
    %c0_6 = arith.constant 0 : index
    %35 = vector.load %arg3[%c0_5, %c0_6] : memref<1x168xf32, #tpu.memory_space<vmem>>, vector<1x168xf32>
    %36 = vector.broadcast %35 : vector<1x168xf32> to vector<28x168xf32>
    %37 = arith.addf %34, %36 : vector<28x168xf32>
    %cst_7 = arith.constant 0.000000e+00 : f32
    %38 = vector.broadcast %cst_7 : f32 to vector<28x168xf32>
    %39 = arith.maximumf %37, %38 : vector<28x168xf32>
    %40 = vector.extract_strided_slice %39 {offsets = [0, 0], sizes = [28, 84], strides = [1, 1]} : vector<28x168xf32> to vector<28x84xf32>
    %41 = vector.extract_strided_slice %39 {offsets = [0, 84], sizes = [28, 84], strides = [1, 1]} : vector<28x168xf32> to vector<28x84xf32>
    %42 = arith.maximumf %40, %41 : vector<28x84xf32>
    %c0_8 = arith.constant 0 : index
    %c0_9 = arith.constant 0 : index
    %43 = vector.load %arg4[%c0_8, %c0_9] : memref<14x28xf32, #tpu.memory_space<vmem>>, vector<14x28xf32>
    %cst_10 = arith.constant dense<0.000000e+00> : vector<14x84xf32>
    %44 = tpu.matmul %43, %42, %cst_10 {dimension_numbers = #tpu.dot_dimension_numbers<[1], [0], [0], [1], [0, 0, 1, 1], [], []>} : vector<14x28xf32>, vector<28x84xf32>, vector<14x84xf32> -> vector<14x84xf32>
    %c0_11 = arith.constant 0 : index
    %c0_12 = arith.constant 0 : index
    %45 = vector.load %arg5[%c0_11, %c0_12] : memref<14x28xf32, #tpu.memory_space<vmem>>, vector<14x28xf32>
    %cst_13 = arith.constant dense<0.000000e+00> : vector<14x84xf32>
    %46 = tpu.matmul %45, %42, %cst_13 {dimension_numbers = #tpu.dot_dimension_numbers<[1], [0], [0], [1], [0, 0, 1, 1], [], []>} : vector<14x28xf32>, vector<28x84xf32>, vector<14x84xf32> -> vector<14x84xf32>
    %47 = arith.maximumf %44, %46 : vector<14x84xf32>
    %48 = vector.extract_strided_slice %47 {offsets = [0, 0], sizes = [10, 14], strides = [1, 1]} : vector<14x84xf32> to vector<10x14xf32>
    %49 = vector.extract_strided_slice %47 {offsets = [0, 14], sizes = [10, 14], strides = [1, 1]} : vector<14x84xf32> to vector<10x14xf32>
    %50 = vector.extract_strided_slice %47 {offsets = [0, 28], sizes = [10, 14], strides = [1, 1]} : vector<14x84xf32> to vector<10x14xf32>
    %51 = vector.extract_strided_slice %47 {offsets = [0, 42], sizes = [10, 14], strides = [1, 1]} : vector<14x84xf32> to vector<10x14xf32>
    %52 = vector.extract_strided_slice %47 {offsets = [0, 56], sizes = [10, 14], strides = [1, 1]} : vector<14x84xf32> to vector<10x14xf32>
    %53 = vector.extract_strided_slice %47 {offsets = [0, 70], sizes = [10, 14], strides = [1, 1]} : vector<14x84xf32> to vector<10x14xf32>
    %54 = vector.extract_strided_slice %47 {offsets = [1, 0], sizes = [10, 14], strides = [1, 1]} : vector<14x84xf32> to vector<10x14xf32>
    %55 = vector.extract_strided_slice %47 {offsets = [1, 14], sizes = [10, 14], strides = [1, 1]} : vector<14x84xf32> to vector<10x14xf32>
    %56 = vector.extract_strided_slice %47 {offsets = [1, 28], sizes = [10, 14], strides = [1, 1]} : vector<14x84xf32> to vector<10x14xf32>
    %57 = vector.extract_strided_slice %47 {offsets = [1, 42], sizes = [10, 14], strides = [1, 1]} : vector<14x84xf32> to vector<10x14xf32>
    %58 = vector.extract_strided_slice %47 {offsets = [1, 56], sizes = [10, 14], strides = [1, 1]} : vector<14x84xf32> to vector<10x14xf32>
    %59 = vector.extract_strided_slice %47 {offsets = [1, 70], sizes = [10, 14], strides = [1, 1]} : vector<14x84xf32> to vector<10x14xf32>
    %60 = vector.extract_strided_slice %47 {offsets = [2, 0], sizes = [10, 14], strides = [1, 1]} : vector<14x84xf32> to vector<10x14xf32>
    %61 = vector.extract_strided_slice %47 {offsets = [2, 14], sizes = [10, 14], strides = [1, 1]} : vector<14x84xf32> to vector<10x14xf32>
    %62 = vector.extract_strided_slice %47 {offsets = [2, 28], sizes = [10, 14], strides = [1, 1]} : vector<14x84xf32> to vector<10x14xf32>
    %63 = vector.extract_strided_slice %47 {offsets = [2, 42], sizes = [10, 14], strides = [1, 1]} : vector<14x84xf32> to vector<10x14xf32>
    %64 = vector.extract_strided_slice %47 {offsets = [2, 56], sizes = [10, 14], strides = [1, 1]} : vector<14x84xf32> to vector<10x14xf32>
    %65 = vector.extract_strided_slice %47 {offsets = [2, 70], sizes = [10, 14], strides = [1, 1]} : vector<14x84xf32> to vector<10x14xf32>
    %66 = vector.extract_strided_slice %47 {offsets = [3, 0], sizes = [10, 14], strides = [1, 1]} : vector<14x84xf32> to vector<10x14xf32>
    %67 = vector.extract_strided_slice %47 {offsets = [3, 14], sizes = [10, 14], strides = [1, 1]} : vector<14x84xf32> to vector<10x14xf32>
    %68 = vector.extract_strided_slice %47 {offsets = [3, 28], sizes = [10, 14], strides = [1, 1]} : vector<14x84xf32> to vector<10x14xf32>
    %69 = vector.extract_strided_slice %47 {offsets = [3, 42], sizes = [10, 14], strides = [1, 1]} : vector<14x84xf32> to vector<10x14xf32>
    %70 = vector.extract_strided_slice %47 {offsets = [3, 56], sizes = [10, 14], strides = [1, 1]} : vector<14x84xf32> to vector<10x14xf32>
    %71 = vector.extract_strided_slice %47 {offsets = [3, 70], sizes = [10, 14], strides = [1, 1]} : vector<14x84xf32> to vector<10x14xf32>
    %72 = vector.extract_strided_slice %47 {offsets = [4, 0], sizes = [10, 14], strides = [1, 1]} : vector<14x84xf32> to vector<10x14xf32>
    %73 = vector.extract_strided_slice %47 {offsets = [4, 14], sizes = [10, 14], strides = [1, 1]} : vector<14x84xf32> to vector<10x14xf32>
    %74 = vector.extract_strided_slice %47 {offsets = [4, 28], sizes = [10, 14], strides = [1, 1]} : vector<14x84xf32> to vector<10x14xf32>
    %75 = vector.extract_strided_slice %47 {offsets = [4, 42], sizes = [10, 14], strides = [1, 1]} : vector<14x84xf32> to vector<10x14xf32>
    %76 = vector.extract_strided_slice %47 {offsets = [4, 56], sizes = [10, 14], strides = [1, 1]} : vector<14x84xf32> to vector<10x14xf32>
    %77 = vector.extract_strided_slice %47 {offsets = [4, 70], sizes = [10, 14], strides = [1, 1]} : vector<14x84xf32> to vector<10x14xf32>
    %78 = tpu.concatenate %48, %49, %50, %51, %52, %53, %54, %55, %56, %57, %58, %59, %60, %61, %62, %63 in 1 : vector<10x14xf32>, vector<10x14xf32>, vector<10x14xf32>, vector<10x14xf32>, vector<10x14xf32>, vector<10x14xf32>, vector<10x14xf32>, vector<10x14xf32>, vector<10x14xf32>, vector<10x14xf32>, vector<10x14xf32>, vector<10x14xf32>, vector<10x14xf32>, vector<10x14xf32>, vector<10x14xf32>, vector<10x14xf32> -> vector<10x224xf32>
    %79 = tpu.concatenate %64, %65, %66, %67, %68, %69, %70, %71, %72, %73, %74, %75, %76, %77 in 1 : vector<10x14xf32>, vector<10x14xf32>, vector<10x14xf32>, vector<10x14xf32>, vector<10x14xf32>, vector<10x14xf32>, vector<10x14xf32>, vector<10x14xf32>, vector<10x14xf32>, vector<10x14xf32>, vector<10x14xf32>, vector<10x14xf32>, vector<10x14xf32>, vector<10x14xf32> -> vector<10x196xf32>
    %80 = tpu.concatenate %78, %79 in 1 : vector<10x224xf32>, vector<10x196xf32> -> vector<10x420xf32>
    %c0_14 = arith.constant 0 : index
    %c0_15 = arith.constant 0 : index
    %81 = vector.load %arg6[%c0_14, %c0_15] : memref<420x160xf32, #tpu.memory_space<vmem>>, vector<420x160xf32>
    %cst_16 = arith.constant dense<0.000000e+00> : vector<10x160xf32>
    %82 = tpu.matmul %80, %81, %cst_16 {dimension_numbers = #tpu.dot_dimension_numbers<[1], [0], [0], [1], [0, 0, 1, 1], [], []>} : vector<10x420xf32>, vector<420x160xf32>, vector<10x160xf32> -> vector<10x160xf32>
    %c0_17 = arith.constant 0 : index
    %c0_18 = arith.constant 0 : index
    %83 = vector.load %arg7[%c0_17, %c0_18] : memref<1x160xf32, #tpu.memory_space<vmem>>, vector<1x160xf32>
    %84 = vector.broadcast %83 : vector<1x160xf32> to vector<10x160xf32>
    %85 = arith.addf %82, %84 : vector<10x160xf32>
    %cst_19 = arith.constant 0.000000e+00 : f32
    %86 = vector.broadcast %cst_19 : f32 to vector<10x160xf32>
    %87 = arith.maximumf %85, %86 : vector<10x160xf32>
    %88 = vector.extract_strided_slice %87 {offsets = [0, 0], sizes = [10, 80], strides = [1, 1]} : vector<10x160xf32> to vector<10x80xf32>
    %89 = vector.extract_strided_slice %87 {offsets = [0, 80], sizes = [10, 80], strides = [1, 1]} : vector<10x160xf32> to vector<10x80xf32>
    %90 = arith.maximumf %88, %89 : vector<10x80xf32>
    %c0_20 = arith.constant 0 : index
    %c0_21 = arith.constant 0 : index
    %91 = vector.load %arg8[%c0_20, %c0_21] : memref<5x10xf32, #tpu.memory_space<vmem>>, vector<5x10xf32>
    %cst_22 = arith.constant dense<0.000000e+00> : vector<5x80xf32>
    %92 = tpu.matmul %91, %90, %cst_22 {dimension_numbers = #tpu.dot_dimension_numbers<[1], [0], [0], [1], [0, 0, 1, 1], [], []>} : vector<5x10xf32>, vector<10x80xf32>, vector<5x80xf32> -> vector<5x80xf32>
    %c0_23 = arith.constant 0 : index
    %c0_24 = arith.constant 0 : index
    %93 = vector.load %arg9[%c0_23, %c0_24] : memref<5x10xf32, #tpu.memory_space<vmem>>, vector<5x10xf32>
    %cst_25 = arith.constant dense<0.000000e+00> : vector<5x80xf32>
    %94 = tpu.matmul %93, %90, %cst_25 {dimension_numbers = #tpu.dot_dimension_numbers<[1], [0], [0], [1], [0, 0, 1, 1], [], []>} : vector<5x10xf32>, vector<10x80xf32>, vector<5x80xf32> -> vector<5x80xf32>
    %95 = arith.maximumf %92, %94 : vector<5x80xf32>
    %96 = vector.extract_strided_slice %95 {offsets = [0, 0], sizes = [1, 80], strides = [1, 1]} : vector<5x80xf32> to vector<1x80xf32>
    %c0_26 = arith.constant 0 : index
    %c0_27 = arith.constant 0 : index
    %c0_28 = arith.constant 0 : index
    %97 = vector.load %arg10[%c0_26, %c0_27, %c0_28] : memref<5x80x120xf32, #tpu.memory_space<vmem>>, vector<1x80x120xf32>
    %98 = vector.shape_cast %97 : vector<1x80x120xf32> to vector<80x120xf32>
    %cst_29 = arith.constant dense<0.000000e+00> : vector<1x120xf32>
    %99 = tpu.matmul %96, %98, %cst_29 {dimension_numbers = #tpu.dot_dimension_numbers<[1], [0], [0], [1], [0, 0, 1, 1], [], []>} : vector<1x80xf32>, vector<80x120xf32>, vector<1x120xf32> -> vector<1x120xf32>
    %100 = vector.extract_strided_slice %95 {offsets = [1, 0], sizes = [1, 80], strides = [1, 1]} : vector<5x80xf32> to vector<1x80xf32>
    %c1 = arith.constant 1 : index
    %c0_30 = arith.constant 0 : index
    %c0_31 = arith.constant 0 : index
    %101 = vector.load %arg10[%c1, %c0_30, %c0_31] : memref<5x80x120xf32, #tpu.memory_space<vmem>>, vector<1x80x120xf32>
    %102 = vector.shape_cast %101 : vector<1x80x120xf32> to vector<80x120xf32>
    %cst_32 = arith.constant dense<0.000000e+00> : vector<1x120xf32>
    %103 = tpu.matmul %100, %102, %cst_32 {dimension_numbers = #tpu.dot_dimension_numbers<[1], [0], [0], [1], [0, 0, 1, 1], [], []>} : vector<1x80xf32>, vector<80x120xf32>, vector<1x120xf32> -> vector<1x120xf32>
    %104 = arith.addf %99, %103 : vector<1x120xf32>
    %105 = vector.extract_strided_slice %95 {offsets = [2, 0], sizes = [1, 80], strides = [1, 1]} : vector<5x80xf32> to vector<1x80xf32>
    %c2 = arith.constant 2 : index
    %c0_33 = arith.constant 0 : index
    %c0_34 = arith.constant 0 : index
    %106 = vector.load %arg10[%c2, %c0_33, %c0_34] : memref<5x80x120xf32, #tpu.memory_space<vmem>>, vector<1x80x120xf32>
    %107 = vector.shape_cast %106 : vector<1x80x120xf32> to vector<80x120xf32>
    %cst_35 = arith.constant dense<0.000000e+00> : vector<1x120xf32>
    %108 = tpu.matmul %105, %107, %cst_35 {dimension_numbers = #tpu.dot_dimension_numbers<[1], [0], [0], [1], [0, 0, 1, 1], [], []>} : vector<1x80xf32>, vector<80x120xf32>, vector<1x120xf32> -> vector<1x120xf32>
    %109 = arith.addf %104, %108 : vector<1x120xf32>
    %110 = vector.extract_strided_slice %95 {offsets = [3, 0], sizes = [1, 80], strides = [1, 1]} : vector<5x80xf32> to vector<1x80xf32>
    %c3 = arith.constant 3 : index
    %c0_36 = arith.constant 0 : index
    %c0_37 = arith.constant 0 : index
    %111 = vector.load %arg10[%c3, %c0_36, %c0_37] : memref<5x80x120xf32, #tpu.memory_space<vmem>>, vector<1x80x120xf32>
    %112 = vector.shape_cast %111 : vector<1x80x120xf32> to vector<80x120xf32>
    %cst_38 = arith.constant dense<0.000000e+00> : vector<1x120xf32>
    %113 = tpu.matmul %110, %112, %cst_38 {dimension_numbers = #tpu.dot_dimension_numbers<[1], [0], [0], [1], [0, 0, 1, 1], [], []>} : vector<1x80xf32>, vector<80x120xf32>, vector<1x120xf32> -> vector<1x120xf32>
    %114 = arith.addf %109, %113 : vector<1x120xf32>
    %115 = vector.extract_strided_slice %95 {offsets = [4, 0], sizes = [1, 80], strides = [1, 1]} : vector<5x80xf32> to vector<1x80xf32>
    %c4 = arith.constant 4 : index
    %c0_39 = arith.constant 0 : index
    %c0_40 = arith.constant 0 : index
    %116 = vector.load %arg10[%c4, %c0_39, %c0_40] : memref<5x80x120xf32, #tpu.memory_space<vmem>>, vector<1x80x120xf32>
    %117 = vector.shape_cast %116 : vector<1x80x120xf32> to vector<80x120xf32>
    %cst_41 = arith.constant dense<0.000000e+00> : vector<1x120xf32>
    %118 = tpu.matmul %115, %117, %cst_41 {dimension_numbers = #tpu.dot_dimension_numbers<[1], [0], [0], [1], [0, 0, 1, 1], [], []>} : vector<1x80xf32>, vector<80x120xf32>, vector<1x120xf32> -> vector<1x120xf32>
    %119 = arith.addf %114, %118 : vector<1x120xf32>
    %c0_42 = arith.constant 0 : index
    %c0_43 = arith.constant 0 : index
    %120 = vector.load %arg11[%c0_42, %c0_43] : memref<1x120xf32, #tpu.memory_space<vmem>>, vector<1x120xf32>
    %121 = arith.addf %119, %120 : vector<1x120xf32>
    %cst_44 = arith.constant 0.000000e+00 : f32
    %122 = vector.broadcast %cst_44 : f32 to vector<1x120xf32>
    %123 = arith.maximumf %121, %122 : vector<1x120xf32>
    %c0_45 = arith.constant 0 : index
    %c0_46 = arith.constant 0 : index
    %124 = vector.load %arg12[%c0_45, %c0_46] : memref<120x84xf32, #tpu.memory_space<vmem>>, vector<120x84xf32>
    %cst_47 = arith.constant dense<0.000000e+00> : vector<1x84xf32>
    %125 = tpu.matmul %123, %124, %cst_47 {dimension_numbers = #tpu.dot_dimension_numbers<[1], [0], [0], [1], [0, 0, 1, 1], [], []>} : vector<1x120xf32>, vector<120x84xf32>, vector<1x84xf32> -> vector<1x84xf32>
    %c0_48 = arith.constant 0 : index
    %c0_49 = arith.constant 0 : index
    %126 = vector.load %arg13[%c0_48, %c0_49] : memref<1x84xf32, #tpu.memory_space<vmem>>, vector<1x84xf32>
    %127 = arith.addf %125, %126 : vector<1x84xf32>
    %cst_50 = arith.constant 0.000000e+00 : f32
    %128 = vector.broadcast %cst_50 : f32 to vector<1x84xf32>
    %129 = arith.maximumf %127, %128 : vector<1x84xf32>
    %c0_51 = arith.constant 0 : index
    %c0_52 = arith.constant 0 : index
    %130 = vector.load %arg14[%c0_51, %c0_52] : memref<84x10xf32, #tpu.memory_space<vmem>>, vector<84x10xf32>
    %cst_53 = arith.constant dense<0.000000e+00> : vector<1x10xf32>
    %131 = tpu.matmul %129, %130, %cst_53 {dimension_numbers = #tpu.dot_dimension_numbers<[1], [0], [0], [1], [0, 0, 1, 1], [], []>} : vector<1x84xf32>, vector<84x10xf32>, vector<1x10xf32> -> vector<1x10xf32>
    %c0_54 = arith.constant 0 : index
    %c0_55 = arith.constant 0 : index
    %132 = vector.load %arg15[%c0_54, %c0_55] : memref<1x10xf32, #tpu.memory_space<vmem>>, vector<1x10xf32>
    %133 = arith.addf %131, %132 : vector<1x10xf32>
    %134 = vector.shape_cast %133 : vector<1x10xf32> to vector<1x1x10xf32>
    %c0_56 = arith.constant 0 : index
    %c0_57 = arith.constant 0 : index
    %c0_58 = arith.constant 0 : index
    %135 = vector.load %arg16[%c0_56, %c0_57, %c0_58] : memref<1x1x10xf32, #tpu.memory_space<vmem>>, vector<1x1x10xf32>
    tpu.vector_store %arg16[%c0_56, %c0_57, %c0_58], %134 {strides = array<i32>} : memref<1x1x10xf32, #tpu.memory_space<vmem>>, vector<1x1x10xf32>,
    return
  }
  func.func @transform_0(%arg0: i32) -> (i32, i32, i32, i32) {
    %c0_i32 = arith.constant 0 : i32
    %c0_i32_0 = arith.constant 0 : i32
    %c0_i32_1 = arith.constant 0 : i32
    %c0_i32_2 = arith.constant 0 : i32
    return %arg0, %c0_i32, %c0_i32_0, %c0_i32_1 : i32, i32, i32, i32
  }
  func.func @transform_1(%arg0: i32) -> (i32, i32) {
    %c0_i32 = arith.constant 0 : i32
    %c0_i32_0 = arith.constant 0 : i32
    %c0_i32_1 = arith.constant 0 : i32
    return %c0_i32, %c0_i32_0 : i32, i32
  }
  func.func @transform_2(%arg0: i32) -> (i32, i32) {
    %c0_i32 = arith.constant 0 : i32
    %c0_i32_0 = arith.constant 0 : i32
    %c0_i32_1 = arith.constant 0 : i32
    return %c0_i32, %c0_i32_0 : i32, i32
  }
  func.func @transform_3(%arg0: i32) -> (i32, i32) {
    %c0_i32 = arith.constant 0 : i32
    %c0_i32_0 = arith.constant 0 : i32
    %c0_i32_1 = arith.constant 0 : i32
    return %c0_i32, %c0_i32_0 : i32, i32
  }
  func.func @transform_4(%arg0: i32) -> (i32, i32) {
    %c0_i32 = arith.constant 0 : i32
    %c0_i32_0 = arith.constant 0 : i32
    %c0_i32_1 = arith.constant 0 : i32
    return %c0_i32, %c0_i32_0 : i32, i32
  }
  func.func @transform_5(%arg0: i32) -> (i32, i32) {
    %c0_i32 = arith.constant 0 : i32
    %c0_i32_0 = arith.constant 0 : i32
    %c0_i32_1 = arith.constant 0 : i32
    return %c0_i32, %c0_i32_0 : i32, i32
  }
  func.func @transform_6(%arg0: i32) -> (i32, i32) {
    %c0_i32 = arith.constant 0 : i32
    %c0_i32_0 = arith.constant 0 : i32
    %c0_i32_1 = arith.constant 0 : i32
    return %c0_i32, %c0_i32_0 : i32, i32
  }
  func.func @transform_7(%arg0: i32) -> (i32, i32) {
    %c0_i32 = arith.constant 0 : i32
    %c0_i32_0 = arith.constant 0 : i32
    %c0_i32_1 = arith.constant 0 : i32
    return %c0_i32, %c0_i32_0 : i32, i32
  }
  func.func @transform_8(%arg0: i32) -> (i32, i32) {
    %c0_i32 = arith.constant 0 : i32
    %c0_i32_0 = arith.constant 0 : i32
    %c0_i32_1 = arith.constant 0 : i32
    return %c0_i32, %c0_i32_0 : i32, i32
  }
  func.func @transform_9(%arg0: i32) -> (i32, i32, i32) {
    %c0_i32 = arith.constant 0 : i32
    %c0_i32_0 = arith.constant 0 : i32
    %c0_i32_1 = arith.constant 0 : i32
    %c0_i32_2 = arith.constant 0 : i32
    return %c0_i32, %c0_i32_0, %c0_i32_1 : i32, i32, i32
  }
  func.func @transform_10(%arg0: i32) -> (i32, i32) {
    %c0_i32 = arith.constant 0 : i32
    %c0_i32_0 = arith.constant 0 : i32
    %c0_i32_1 = arith.constant 0 : i32
    return %c0_i32, %c0_i32_0 : i32, i32
  }
  func.func @transform_11(%arg0: i32) -> (i32, i32) {
    %c0_i32 = arith.constant 0 : i32
    %c0_i32_0 = arith.constant 0 : i32
    %c0_i32_1 = arith.constant 0 : i32
    return %c0_i32, %c0_i32_0 : i32, i32
  }
  func.func @transform_12(%arg0: i32) -> (i32, i32) {
    %c0_i32 = arith.constant 0 : i32
    %c0_i32_0 = arith.constant 0 : i32
    %c0_i32_1 = arith.constant 0 : i32
    return %c0_i32, %c0_i32_0 : i32, i32
  }
  func.func @transform_13(%arg0: i32) -> (i32, i32) {
    %c0_i32 = arith.constant 0 : i32
    %c0_i32_0 = arith.constant 0 : i32
    %c0_i32_1 = arith.constant 0 : i32
    return %c0_i32, %c0_i32_0 : i32, i32
  }
  func.func @transform_14(%arg0: i32) -> (i32, i32) {
    %c0_i32 = arith.constant 0 : i32
    %c0_i32_0 = arith.constant 0 : i32
    %c0_i32_1 = arith.constant 0 : i32
    return %c0_i32, %c0_i32_0 : i32, i32
  }
  func.func @transform_15(%arg0: i32) -> (i32, i32, i32) {
    %c0_i32 = arith.constant 0 : i32
    %c0_i32_0 = arith.constant 0 : i32
    %c0_i32_1 = arith.constant 0 : i32
    return %arg0, %c0_i32, %c0_i32_0 : i32, i32, i32
  }
}

</mosaic_0001>

<bundles_post_ra>
// kernel: net_forward.1
= control target key start
LH: loop header
LB: loop body
LE: loop exit
PB: predicated region body
PF: predicated region fallthrough
CT: control target
= control target key end

     0   :  { %20 = vsyncpa [#allocation3], 0  ;;  %s5172_s0 = inlined_call_operand.vmem [shape: f32[8,3,32,32], index: 0, kind: input, shape index: {}]   ;;  %s5173_s1 = inlined_call_operand.vmem [shape: f32[480,168], index: 1, kind: input, shape index: {}]   ;;  %s5174_s2 = inlined_call_operand.vmem [shape: f32[1,168], index: 2, kind: input, shape index: {}]   ;;  %s5175_s3 = inlined_call_operand.vmem [shape: f32[14,28], index: 3, kind: input, shape index: {}]   ;;  %s5176_s4 = inlined_call_operand.vmem [shape: f32[14,28], index: 4, kind: input, shape index: {}]   ;;  %s5177_s5 = inlined_call_operand.vmem [shape: f32[420,160], index: 5, kind: input, shape index: {}]   ;;  %s5178_s6 = inlined_call_operand.vmem [shape: f32[1,160], index: 6, kind: input, shape index: {}]   ;;  %s5179_s7 = inlined_call_operand.vmem [shape: f32[5,10], index: 7, kind: input, shape index: {}]   ;;  %s5180_s8 = inlined_call_operand.vmem [shape: f32[5,10], index: 8, kind: input, shape index: {}]   ;;  %s5181_s9 = inlined_call_operand.vmem [shape: f32[5,80,120], index: 9, kind: input, shape index: {}]   ;;  %s5182_s10 = inlined_call_operand.vmem [shape: f32[1,120], index: 10, kind: input, shape index: {}]   ;;  %s5183_s11 = inlined_call_operand.vmem [shape: f32[120,84], index: 11, kind: input, shape index: {}]   ;;  %s5184_s12 = inlined_call_operand.vmem [shape: f32[1,84], index: 12, kind: input, shape index: {}]   ;;  %s5185_s13 = inlined_call_operand.vmem [shape: f32[84,10], index: 13, kind: input, shape index: {}]   ;;  %s5186_s14 = inlined_call_operand.vmem [shape: f32[1,10], index: 14, kind: input, shape index: {}]   ;;  %s5187_s15 = inlined_call_operand.hbm [shape: f32[8,1,10], index: 15, kind: output, shape index: {}]  }
   0x1   :  { %22 = vsyncpa [#allocation3 + $0x1], 0  ;;  %s3694_s18 = smov 0   ;;  %s3696_s19 = smov 0  }
   0x2   :  { %s3698_s20 = smov 0   ;;  %s3700_s21 = smov 0  }
   0x3 LB: > { %5197 = sst [smem:[#allocation5_spill]] %s3585_s18  ;;  %s3715_s22 = sadd.s32 4294967295, %s3597_s21   ;;  %s3597_s21 = sphi %s3700_s21, %s5210_s21   ;;  %s3593_s20 = sphi %s3698_s20, %s5212_s20   ;;  %s3589_s19 = sphi %s3696_s19, %s5214_s19   ;;  %s3585_s18 = sphi %s3694_s18, %s5213_s18  }
   0x4   : > { %5198 = sst [smem:[#allocation6_spill]] %s3593_s20  ;;  %s2585_s23 = sadd.s32 4294967294, %s3597_s21  }
   0x5   : > { %5199 = sst [smem:[#allocation7_spill]] %s3597_s21  ;;  %s3719_s24 = sadd.s32 1, %s3597_s21  }
   0x6   : > { %5200 = sst [smem:[#allocation8_spill]] %s3719_s24  ;;  %s355_s25 = sadd.s32 1, %s3593_s20 }
   0x7   : > { %s352_s26 = ssub.s32 %s3597_s21, %s3719_s24  ;;  %p365_p0 = scmp.ne.s32.totalorder %s3593_s20, %s3589_s19 }
   0x8   : > { %p353_p1 = scmp.eq.s32.totalorder %s352_s26, 0  ;;  %p366_p2 = scmp.eq.s32.totalorder %s3715_s22, 7 }
   0x9   : > { %p371_p3 = scmp.ne.s32.totalorder %s3589_s19, %s3585_s18  ;;  %p372_p4 = scmp.eq.s32.totalorder %s2585_s23, 7 }
   0xa   : > { %s3730_s27 = scalar_select %p353_p1, %s3593_s20, %s355_s25  }
   0xb   : > { %p3732_p5 = por %p366_p2, %p365_p0  ;;  %p3736_p6 = por %p372_p4, %p371_p3 }
   0xc   : > { %5201 = sst [smem:[#allocation9_spill]] %s3730_s27  ;;  %p2588_p7 = scmp.ge.s32.totalorder %s3597_s21, 1 }
   0xd   : > { %s5203_s29 = scalar_select %p3736_p6, 1, 0 }
   0xe   : > { %p440_p8 = scmp.lt.s32.totalorder %s3597_s21, 9 }
   0xf   : > { %5204 = sst [smem:[#allocation10_spill]] %s5203_s29 }
  0x10   : > { %p441_p9 = pnand %p2588_p7, %p440_p8 }
  0x11   : > { %p487_p10 = scmp.lt.s32.totalorder (!%p441_p9), %s3715_s22, 7  ;;  %v796_v0 = vld [vmem:[%s5173_s1 + $0x8] sm:$0xff] (!%p441_p9)  ;;  %v798_v1 = vld [vmem:[%s5173_s1 + $0x18] sm:$0xff] (!%p441_p9)  ;;  %v795_v2 = vld [vmem:[%s5173_s1] sm:$0xff] (!%p441_p9)  ;;  %vm540_vm0 = vcmask (!%p441_p9), 1046528   ;;  %vm590_vm1 = vcmask (!%p441_p9), 1045504  }
  0x12   : > { %444 = sbr.rel (%p441_p9) target bundleno = 2359 (0x937), region = 80  ;;  %v2969_v3 = vpack.c.bf16 (!%p441_p9), %v798_v1, %v796_v0  ;;  %v797_v4 = vld [vmem:[%s5173_s1 + $0x10] sm:$0xff] (!%p441_p9)  ;;  %v800_v5 = vld [vmem:[%s5173_s1 + $0x28] sm:$0xff] (!%p441_p9)  ;;  %v802_v6 = vld [vmem:[%s5173_s1 + $0x38] sm:$0xff] (!%p441_p9)  ;;  %s5194_s24 = smov (!%p441_p9), 96   ;;  %vm640_vm2 = vcmask (!%p441_p9), 1044480  }
  0x13   : > { %v2971_v7 = vpack.c.bf16 (!%p441_p9), %v797_v4, %v795_v2  ;;  %v2973_v8 = vpack.c.bf16 (!%p441_p9), %v802_v6, %v800_v5  ;;  %v799_v9 = vld [vmem:[%s5173_s1 + $0x20] sm:$0xff] (!%p441_p9)  ;;  %v801_v10 = vld [vmem:[%s5173_s1 + $0x30] sm:$0xff] (!%p441_p9)  ;;  %v804_v11 = vld [vmem:[%s5173_s1 + $0x48] sm:$0xff] (!%p441_p9)  ;;  %s3601_s29 = smov (!%p441_p9), 64   ;;  %vm698_vm3 = vcmask (!%p441_p9), 1043456   ;;  %vm748_vm4 = vcmask (!%p441_p9), 261120  }
  0x14   : > { %2970 = vmatprep.subr.bf16.mxu0 (!%p441_p9), %v2969_v3  ;;  %v806_v12 = vld [vmem:[%s5173_s1 + $0x58] sm:$0xff] (!%p441_p9)  ;;  %v2975_v13 = vpack.c.bf16 (!%p441_p9), %v801_v10, %v799_v9  ;;  %v803_v14 = vld [vmem:[%s5173_s1 + $0x40] sm:$0xff] (!%p441_p9)  ;;  %v805_v15 = vld [vmem:[%s5173_s1 + $0x50] sm:$0xff] (!%p441_p9)  ;;  %vm753_vm5 = vcmask (!%p441_p9), 523264   ;;  %vm758_vm6 = vcmask (!%p441_p9), 785408   ;;  %s3602_s17 = smov (!%p441_p9), 44  }
  0x15   : > { %2972 = vmatpush1.bf16.msra.mxu0 (!%p441_p9), %v2971_v7  ;;  %v2977_v16 = vpack.c.bf16 (!%p441_p9), %v806_v12, %v804_v11  ;;  %v808_v17 = vld [vmem:[%s5173_s1 + $0x68] sm:$0xff] (!%p441_p9)  ;;  %v810_v18 = vld [vmem:[%s5173_s1 + $0x78] sm:$0xff] (!%p441_p9)  ;;  %v2979_v28 = vpack.c.bf16 (!%p441_p9), %v805_v15, %v803_v14  ;;  %v807_v39 = vld [vmem:[%s5173_s1 + $0x60] sm:$0xff] (!%p441_p9)  ;;  %vm1164_vm7 = vcmask (!%p441_p9), 228352   ;;  %vm1149_vm8 = vcmask (!%p441_p9), 359424   ;;  %s3604_s30 = smov (!%p441_p9), 72  }
  0x16   : > { %2974 = vmatprep.subr.bf16.mxu0 (!%p441_p9), %v2973_v8  ;;  %v2981_v38 = vpack.c.bf16 (!%p441_p9), %v810_v18, %v808_v17  ;;  %v809_v46 = vld [vmem:[%s5173_s1 + $0x70] sm:$0xff] (!%p441_p9)  ;;  %v812_v49 = vld [vmem:[%s5173_s1 + $0x88] sm:$0xff] (!%p441_p9)  ;;  %v814_v50 = vld [vmem:[%s5173_s1 + $0x98] sm:$0xff] (!%p441_p9)  ;;  %vm3603_vm9 = vmmov (!%p441_p9), 1   ;;  %s3605_s16 = smov (!%p441_p9), 28   ;;  %s5196_s23 = smov (!%p441_p9), 40  }
  0x17   : > { %v2983_v57 = vpack.c.bf16 (!%p441_p9), %v809_v46, %v807_v39  ;;  %v2985_v61 = vpack.c.bf16 (!%p441_p9), %v814_v50, %v812_v49  ;;  %v811_v11 = vld [vmem:[%s5173_s1 + $0x80] sm:$0xff] (!%p441_p9)  ;;  %v813_v14 = vld [vmem:[%s5173_s1 + $0x90] sm:$0xff] (!%p441_p9)  ;;  %v816_v15 = vld [vmem:[%s5173_s1 + $0xa8] sm:$0xff] (!%p441_p9)  ;;  %vm1401_vm11 = vcmask (!%p441_p9), 343040   ;;  %vm1404_vm12 = vcmask (!%p441_p9), 457728   ;;  %s5205_s26 = smov (!%p441_p9), 96  }
  0x18   : > { %v824_v49 = vld [vmem:[%s5173_s1 + $0xe8] sm:$0xff] (!%p441_p9)  ;;  %v826_v50 = vld [vmem:[%s5173_s1 + $0xf8] sm:$0xff] (!%p441_p9)  ;;  %vm3094_vm10 = vmpackc.low (!%p441_p9), %vm698_vm3, %vm3603_vm9  ;;  %vm1354_vm13 = vcmask (!%p441_p9), 687104   ;;  %vm1407_vm14 = vcmask (!%p441_p9), 572416   ;;  %vm1357_vm15 = vcmask (!%p441_p9), 801792   ;;  %s5206_s21 = smov (!%p441_p9), 40  }
  0x19   : > { %s488_s27 = scalar_select %p487_p10, %s3715_s22, 7  ;;  %2976 = vmatpush1.bf16.msra.mxu0 %v2975_v13 }
  0x1a   : > { %2978 = vmatprep.subr.bf16.mxu0 %v2977_v16  ;;  %v818_v16 = vld [vmem:[%s5173_s1 + $0xb8] sm:$0xff] }
  0x1b   : > { %s3356_s18 = smul.u32 96, %s488_s27  ;;  %s3599_s27 = smov 32  }
  0x1d   : > { %s3783_s20 = scalar_lea.vmem %s5172_s0, %s3356_s18  ;;  %2980 = vmatpush1.bf16.msra.mxu0 %v2979_v28  ;;  %v2987_v28 = vpack.c.bf16 %v813_v14, %v811_v11  ;;  %v827_v11 = vld [vmem:[%s5173_s1 + $0x100] sm:$0xff]  ;;  %v832_v14 = vld [vmem:[%s5173_s1 + $0x128] sm:$0xff] }
  0x1e   : > { %v3792_v19 = vld [vmem:[%s3783_s20 + $0x20] sm:$0xff]  ;;  %v3798_v21 = vld [vmem:[%s3783_s20 + $0x48] sm:$0xff]  ;;  %v3817_v33 = vld [vmem:[%s3783_s20 + $0x10] sm:$0xff]  ;;  %2982 = vmatprep.subr.bf16.mxu0 %v2981_v38 }
  0x1f   : > { %v3795_v20 = vld [vmem:[%s3783_s20 + $0x40] sm:$0xff]  ;;  %v572_v23 = vrot.slane %v3798_v21, 1  ;;  %v3806_v25 = vld [vmem:[%s3783_s20 + $0x8] sm:$0xff]  ;;  %v610_v27 = vrot.slane %v3792_v19, 2  ;;  %v594_v36 = vrot.slane %v3817_v33, 2  ;;  %v3823_v37 = vld [vmem:[%s3783_s20 + $0x50] sm:$0xff] }
  0x20   : > { %v571_v22 = vrot.slane %v3795_v20, 1  ;;  %v3803_v24 = vld [vmem:[%s3783_s20] sm:$0xff]  ;;  %v3809_v26 = vld [vmem:[%s3783_s20 + $0x28] sm:$0xff]  ;;  %v592_v30 = vrot.slane %v3806_v25, 2  ;;  %v542_v32 = vrot.slane %v3806_v25, 1  ;;  %v3832_v43 = vld [vmem:[%s3783_s20 + $0x30] sm:$0xff] }
  0x21   : > { %v591_v29 = vrot.slane %v3803_v24, 2  ;;  %v541_v31 = vrot.slane %v3803_v24, 1  ;;  %v611_v35 = vrot.slane %v3809_v26, 2  ;;  %v3835_v44 = vld [vmem:[%s3783_s20 + $0x58] sm:$0xff]  ;;  %v574_v45 = vrot.slane %v3823_v37, 1  ;;  %2984 = vmatpush1.bf16.msra.mxu0 %v2983_v57 }
  0x22   : > { %v573_v34 = vsel %vm540_vm0, %v571_v22, %v572_v23  ;;  %v544_v48 = vrot.slane %v3817_v33, 1  ;;  %v595_v54 = vsel %vm590_vm1, %v592_v30, %v594_v36  ;;  %v576_v55 = vrot.slane %v3835_v44, 1  ;;  %v3858_v59 = vld [vmem:[%s3783_s20 + $0x18] sm:$0xff]  ;;  %2986 = vmatprep.subr.bf16.mxu0 %v2985_v61  ;;  %v815_v22 = vld [vmem:[%s5173_s1 + $0xa0] sm:$0xff] }
  0x23   : > { %v3410_v40 = vpack.i.bf16 %v3792_v19, %v573_v34  ;;  %v593_v41 = vsel %vm590_vm1, %v591_v29, %v592_v30  ;;  %v543_v42 = vsel %vm540_vm0, %v541_v31, %v542_v32  ;;  %v612_v47 = vsel %vm590_vm1, %v610_v27, %v611_v35  ;;  %v3861_v60 = vld [vmem:[%s3783_s20 + $0x38] sm:$0xff]  ;;  %v820_v30 = vld [vmem:[%s5173_s1 + $0xc8] sm:$0xff] }
  0x24   : > { %v3415_v51 = vpack.i.bf16 %v3795_v20, %v593_v41  ;;  %v3420_v52 = vpack.i.bf16 %v543_v42, %v612_v47  ;;  %v575_v53 = vsel %vm540_vm0, %v572_v23, %v574_v45  ;;  %v613_v56 = vrot.slane %v3832_v43, 2  ;;  %v817_v23 = vld [vmem:[%s5173_s1 + $0xb0] sm:$0xff]  ;;  %v822_v31 = vld [vmem:[%s5173_s1 + $0xd8] sm:$0xff]  ;;  %v819_v42 = vld [vmem:[%s5173_s1 + $0xc0] sm:$0xff] }
  0x25   : > { %3411 = vrot.lane.b32.xlu0 %v3410_v40, %s3599_s27  ;;  %v3425_v58 = vpack.i.bf16 %v3809_v26, %v575_v53  ;;  %v545_v62 = vsel %vm540_vm0, %v542_v32, %v544_v48  ;;  %v596_v0 = vrot.slane %v3858_v59, 2  ;;  %v3430_v1 = vpack.i.bf16 %v3798_v21, %v595_v54  ;;  %2988 = vmatpush1.bf16.msra.mxu0 %v2987_v28 }
  0x26   : > { %3421 = vrot.lane.b32.xlu1 %v3420_v52, %s5194_s24  ;;  %v614_v63 = vsel %vm590_vm1, %v611_v35, %v613_v56  ;;  %v577_v2 = vsel %vm540_vm0, %v574_v45, %v576_v55  ;;  %v546_v3 = vrot.slane %v3858_v59, 1  ;;  %v615_v4 = vrot.slane %v3861_v60, 2  ;;  %v821_v45 = vld [vmem:[%s5173_s1 + $0xd0] sm:$0xff] }
  0x27   : > { %v3435_v5 = vpack.i.bf16 %v545_v62, %v614_v63  ;;  %v597_v6 = vsel %vm590_vm1, %v594_v36, %v596_v0  ;;  %v3440_v7 = vpack.i.bf16 %v3832_v43, %v577_v2  ;;  %v641_v12 = vrot.slane %v3803_v24, 3  ;;  %v825_v63 = vld [vmem:[%s5173_s1 + $0xf0] sm:$0xff] }
  0x28   : > { %v547_v8 = vsel %vm540_vm0, %v544_v48, %v546_v3  ;;  %v616_v9 = vsel %vm590_vm1, %v613_v56, %v615_v4  ;;  %v3445_v10 = vpack.i.bf16 %v3823_v37, %v597_v6  ;;  %v642_v13 = vrot.slane %v3806_v25, 3 }
  0x29   : > { %3416 = vrot.lane.b32.xlu0 %v3415_v51, %s3601_s29  ;;  %v3450_v17 = vpack.i.bf16 %v547_v8, %v616_v9  ;;  %v644_v18 = vrot.slane %v3817_v33, 3  ;;  %v3455_v27 = vpack.i.bf16 %v3861_v60, %v576_v55  ;;  %v2989_v29 = vpack.c.bf16 %v818_v16, %v816_v15  ;;  %v834_v15 = vld [vmem:[%s5173_s1 + $0x138] sm:$0xff] }
  0x2a   : > { %3426 = vrot.lane.b32.xlu1 %v3425_v58, %s3599_s27  ;;  %v3460_v32 = vpack.i.bf16 %v3835_v44, %v596_v0  ;;  %v643_v34 = vsel %vm640_vm2, %v641_v12, %v642_v13  ;;  %v660_v35 = vrot.slane %v3792_v19, 3  ;;  %v661_v38 = vrot.slane %v3809_v26, 3  ;;  %v828_v0 = vld [vmem:[%s5173_s1 + $0x108] sm:$0xff]  ;;  %v829_v12 = vld [vmem:[%s5173_s1 + $0x110] sm:$0xff] }
  0x2b   : > { %v645_v36 = vsel %vm640_vm2, %v642_v13, %v644_v18  ;;  %v663_v39 = vrot.slane %v3832_v43, 3  ;;  %v2991_v40 = vpack.c.bf16 %v817_v23, %v815_v22  ;;  %2990 = vmatprep.subr.bf16.mxu0 %v2989_v29  ;;  %v2993_v41 = vpack.c.bf16 %v822_v31, %v820_v30 }
  0x2c   : > { %v3465_v46 = vpack.i.bf16 %v546_v3, %v615_v4  ;;  %v679_v47 = vrot.slane %v3795_v20, 3  ;;  %v680_v48 = vrot.slane %v3798_v21, 3  ;;  %v560_v51 = vrot.slane %v3792_v19, 1 }
  0x2d   : > { %3431 = vrot.lane.b32.xlu0 %v3430_v1, %s3601_s29  ;;  %v3470_v52 = vpack.i.bf16 %v645_v36, %v643_v34  ;;  %v682_v53 = vrot.slane %v3823_v37, 3  ;;  %v710_v54 = vrot.slane %v3792_v19, 4  ;;  %v711_v55 = vrot.slane %v3809_v26, 4  ;;  %2992 = vmatpush1.bf16.msra.mxu0 %v2991_v40  ;;  %v823_v19 = vld [vmem:[%s5173_s1 + $0xe0] sm:$0xff]  ;;  %v836_v36 = vld [vmem:[%s5173_s1 + $0x148] sm:$0xff] }
  0x2e   : > { %3436 = vrot.lane.b32.xlu1 %v3435_v5, %s5194_s24  ;;  %v662_v56 = vsel %vm640_vm2, %v660_v35, %v661_v38  ;;  %v664_v57 = vsel %vm640_vm2, %v661_v38, %v663_v39  ;;  %v2995_v58 = vpack.c.bf16 %v821_v45, %v819_v42  ;;  %v561_v61 = vrot.slane %v3809_v26, 1  ;;  %2994 = vmatprep.subr.bf16.mxu0 %v2993_v41  ;;  %v830_v26 = vld [vmem:[%s5173_s1 + $0x118] sm:$0xff]  ;;  %v831_v34 = vld [vmem:[%s5173_s1 + $0x120] sm:$0xff]  ;;  %v833_v35 = vld [vmem:[%s5173_s1 + $0x130] sm:$0xff] }
  0x2f   : > { %v2997_v62 = vpack.c.bf16 %v826_v50, %v824_v49  ;;  %v3475_v2 = vpack.i.bf16 %v664_v57, %v662_v56  ;;  %v712_v3 = vsel %vm698_vm3, %v710_v54, %v711_v55  ;;  %v730_v4 = vrot.slane %v3798_v21, 4  ;;  %v838_v38 = vld [vmem:[%s5173_s1 + $0x158] sm:$0xff]  ;;  %v835_v49 = vld [vmem:[%s5173_s1 + $0x140] sm:$0xff] }
  0x30   : > { %v3957_v1 = vsel %vm540_vm0, %v560_v51, %v561_v61  ;;  %v729_v5 = vrot.slane %v3795_v20, 4  ;;  %v681_v6 = vsel %vm640_vm2, %v679_v47, %v680_v48  ;;  %v2999_v8 = vpack.c.bf16 %v825_v63, %v823_v19  ;;  %v840_v51 = vld [vmem:[%s5173_s1 + $0x168] sm:$0xff]  ;;  %v839_v19 = vld [vmem:[%s5173_s1 + $0x160] sm:$0xff] }
  0x31   : > { %3441 = vrot.lane.b32.xlu0 %v3440_v7, %s3599_s27  ;;  %v683_v7 = vsel %vm640_vm2, %v680_v48, %v682_v53  ;;  %2996 = vmatpush1.bf16.msra.mxu0 %v2995_v58  ;;  %v563_v9 = vrot.slane %v3832_v43, 1  ;;  %v629_v13 = vrot.slane %v3795_v20, 2  ;;  %v565_v22 = vrot.slane %v3861_v60, 1  ;;  %v844_v63 = vld [vmem:[%s5173_s1 + $0x188] sm:$0xff] }
  0x32   : > { %3446 = vrot.lane.b32.xlu1 %v3445_v10, %s3601_s29  ;;  %2998 = vmatprep.subr.bf16.mxu0 %v2997_v62  ;;  %v3001_v10 = vpack.c.bf16 %v830_v26, %v828_v0  ;;  %v3480_v23 = vpack.i.bf16 %v683_v7, %v681_v6  ;;  %v731_v20 = vsel %vm698_vm3, %v729_v5, %v730_v4  ;;  %v646_v28 = vrot.slane %v3858_v59, 3  ;;  %v846_v0 = vld [vmem:[%s5173_s1 + $0x198] sm:$0xff]  ;;  %v843_v5 = vld [vmem:[%s5173_s1 + $0x180] sm:$0xff]  ;;  %v845_v6 = vld [vmem:[%s5173_s1 + $0x190] sm:$0xff] }
  0x33   : > { %v3983_v16 = vsel %vm540_vm0, %v561_v61, %v563_v9  ;;  %v3003_v29 = vpack.c.bf16 %v829_v12, %v827_v11  ;;  %v732_v31 = vrot.slane %v3823_v37, 4  ;;  %v665_v42 = vrot.slane %v3861_v60, 3  ;;  %v848_v7 = vld [vmem:[%s5173_s1 + $0x1a8] sm:$0xff]  ;;  %v847_v12 = vld [vmem:[%s5173_s1 + $0x1a0] sm:$0xff] }
  0x34   : > { %v647_v41 = vsel %vm640_vm2, %v644_v18, %v646_v28  ;;  %v3007_v45 = vpack.c.bf16 %v833_v35, %v831_v34  ;;  %v715_v47 = vrot.slane %v3861_v60, 4  ;;  %v3009_v48 = vpack.c.bf16 %v838_v38, %v836_v36  ;;  %v837_v18 = vld [vmem:[%s5173_s1 + $0x150] sm:$0xff]  ;;  %v855_v34 = vld [vmem:[%s5173_s1 + $0x1e0] sm:$0xff]  ;;  %v860_v36 = vld [vmem:[%s5173_s1 + $0x208] sm:$0xff] }
  0x35   : > { %3451 = vrot.lane.b32.xlu0 %v3450_v17, %s5194_s24  ;;  %v630_v17 = vrot.slane %v3798_v21, 2  ;;  %3000 = vmatpush1.bf16.msra.mxu0 %v2999_v8  ;;  %v3997_v21 = vsel %vm540_vm0, %v563_v9, %v565_v22  ;;  %v3485_v50 = vpack.i.bf16 %v646_v28, %v647_v41  ;;  %v632_v54 = vrot.slane %v3823_v37, 2  ;;  %v850_v8 = vld [vmem:[%s5173_s1 + $0x1b8] sm:$0xff]  ;;  %v852_v37 = vld [vmem:[%s5173_s1 + $0x1c8] sm:$0xff]  ;;  %v857_v35 = vld [vmem:[%s5173_s1 + $0x1f0] sm:$0xff] }
  0x36   : > { %3456 = vrot.lane.b32.xlu1 %v3455_v27, %s3599_s27  ;;  %v713_v27 = vrot.slane %v3832_v43, 4  ;;  %3002 = vmatprep.subr.bf16.mxu0 %v3001_v10  ;;  %v3011_v56 = vpack.c.bf16 %v837_v18, %v835_v49  ;;  %v734_v61 = vrot.slane %v3835_v44, 4  ;;  %v841_v43 = vld [vmem:[%s5173_s1 + $0x170] sm:$0xff]  ;;  %v684_v26 = vrot.slane %v3835_v44, 3  ;;  %v858_v28 = vld [vmem:[%s5173_s1 + $0x1f8] sm:$0xff]  ;;  %v879_v60 = vld [vmem:[%s5173_s1 + $0x2a0] sm:$0xff] }
  0x37   : > { %v3992_v30 = vsel %vm590_vm1, %v629_v13, %v630_v17  ;;  %v4040_v57 = vsel %vm590_vm1, %v630_v17, %v632_v54  ;;  %v3019_v10 = vpack.c.bf16 %v845_v6, %v843_v5  ;;  %v3021_v11 = vpack.c.bf16 %v850_v8, %v848_v7  ;;  %v849_v13 = vld [vmem:[%s5173_s1 + $0x1b0] sm:$0xff]  ;;  %v851_v17 = vld [vmem:[%s5173_s1 + $0x1c0] sm:$0xff]  ;;  %v862_v38 = vld [vmem:[%s5173_s1 + $0x218] sm:$0xff] }
  0x38   : > { %v714_v40 = vsel %vm698_vm3, %v711_v55, %v713_v27  ;;  %v666_v55 = vsel %vm640_vm2, %v663_v39, %v665_v42  ;;  %v716_v58 = vsel %vm698_vm3, %v713_v27, %v715_v47  ;;  %v685_v9 = vsel %vm640_vm2, %v682_v53, %v684_v26  ;;  %v854_v53 = vld [vmem:[%s5173_s1 + $0x1d8] sm:$0xff]  ;;  %v856_v27 = vld [vmem:[%s5173_s1 + $0x1e8] sm:$0xff]  ;;  %v861_v49 = vld [vmem:[%s5173_s1 + $0x210] sm:$0xff] }
  0x39   : > { %3461 = vrot.lane.b32.xlu0 %v3460_v32, %s3601_s29  ;;  %v3005_v32 = vpack.c.bf16 %v834_v15, %v832_v14  ;;  %3004 = vmatpush1.bf16.msra.mxu0 %v3003_v29  ;;  %v3490_v39 = vpack.i.bf16 %v665_v42, %v666_v55  ;;  %v3023_v14 = vpack.c.bf16 %v849_v13, %v847_v12  ;;  %v864_v55 = vld [vmem:[%s5173_s1 + $0x228] sm:$0xff]  ;;  %v870_v7 = vld [vmem:[%s5173_s1 + $0x258] sm:$0xff]  ;;  %vm1363_vm2 = vcmask 1031168  }
  0x3a   : > { %3466 = vrot.lane.b32.xlu1 %v3465_v46, %s5194_s24  ;;  %v733_v46 = vsel %vm698_vm3, %v730_v4, %v732_v31  ;;  %v3017_v4 = vpack.c.bf16 %v846_v0, %v844_v63  ;;  %v3025_v15 = vpack.c.bf16 %v854_v53, %v852_v37  ;;  %v3033_v41 = vpack.c.bf16 %v862_v38, %v860_v36  ;;  %v863_v63 = vld [vmem:[%s5173_s1 + $0x220] sm:$0xff]  ;;  %v865_v0 = vld [vmem:[%s5173_s1 + $0x230] sm:$0xff]  ;;  %v868_v6 = vld [vmem:[%s5173_s1 + $0x248] sm:$0xff] }
  0x3b   : > { %3006 = vmatprep.subr.bf16.mxu0 %v3005_v32  ;;  %v3029_v32 = vpack.c.bf16 %v858_v28, %v856_v27  ;;  %v3039_v12 = vpack.c.bf16 %v865_v0, %v863_v63  ;;  %v867_v37 = vld [vmem:[%s5173_s1 + $0x240] sm:$0xff]  ;;  %v869_v53 = vld [vmem:[%s5173_s1 + $0x250] sm:$0xff]  ;;  %v872_v28 = vld [vmem:[%s5173_s1 + $0x268] sm:$0xff] }
  0x3c   : > { %v3043_v38 = vpack.c.bf16 %v869_v53, %v867_v37 }
  0x3d   : > { %3471 = vrot.lane.b32.xlu0 %v3470_v52, %s3599_s27  ;;  %v842_v52 = vld [vmem:[%s5173_s1 + $0x178] sm:$0xff]  ;;  %3008 = vmatpush1.bf16.msra.mxu0 %v3007_v45 }
  0x3e   : > { %717 = vrot.lane.b32.xlu1 %v712_v3, %s3599_s27  ;;  %3010 = vmatprep.subr.bf16.mxu0 %v3009_v48  ;;  %v3013_v62 = vpack.c.bf16 %v842_v52, %v840_v51  ;;  %v735_v3 = vsel %vm698_vm3, %v732_v31, %v734_v61  ;;  %v859_v48 = vld [vmem:[%s5173_s1 + $0x200] sm:$0xff] }
  0x41   : > { %3476 = vrot.lane.b32.xlu0 %v3475_v2, %s3601_s29  ;;  %3012 = vmatpush1.bf16.msra.mxu0 %v3011_v56  ;;  %v3015_v2 = vpack.c.bf16 %v841_v43, %v839_v19  ;;  %v866_v56 = vld [vmem:[%s5173_s1 + $0x238] sm:$0xff] }
  0x42   : > { %736 = vrot.lane.b32.xlu1 %v731_v20, %s3601_s29  ;;  %3014 = vmatprep.subr.bf16.mxu0 %v3013_v62  ;;  %v634_v20 = vrot.slane %v3835_v44, 2  ;;  %v3035_v62 = vpack.c.bf16 %v861_v49, %v859_v48  ;;  %v904_v44 = vld [vmem:[%s5173_s1 + $0x368] sm:$0xff] }
  0x44   : > { %v4108_v29 = vsel %vm590_vm1, %v632_v54, %v634_v20 }
  0x45   : > { %3481 = vrot.lane.b32.xlu0 %v3480_v23, %s5194_s24  ;;  %3016 = vmatpush1.bf16.msra.mxu0 %v3015_v2  ;;  %v853_v23 = vld [vmem:[%s5173_s1 + $0x1d0] sm:$0xff] }
  0x46   : > { %719 = vrot.lane.b32.xlu1 %v714_v40, %s3599_s27  ;;  %3018 = vmatprep.subr.bf16.mxu0 %v3017_v4  ;;  %v3027_v31 = vpack.c.bf16 %v853_v23, %v851_v17  ;;  %v3031_v40 = vpack.c.bf16 %v857_v35, %v855_v34  ;;  %v3037_v4 = vpack.c.bf16 %v866_v56, %v864_v55 }
  0x47   : > { %v3041_v23 = vpack.c.bf16 %v870_v7, %v868_v6 }
  0x49   : > { %738 = vrot.lane.b32.xlu0 %v733_v46, %s3601_s29  ;;  %3020 = vmatpush1.bf16.msra.mxu0 %v3019_v10 }
  0x4a   : > { %3486 = vrot.lane.b32.xlu1 %v3485_v50, %s3599_s27  ;;  %3022 = vmatprep.subr.bf16.mxu0 %v3021_v11 }
  0x4d   : > { %721 = vrot.lane.b32.xlu0 %v716_v58, %s3599_s27  ;;  %3024 = vmatpush1.bf16.msra.mxu0 %v3023_v14 }
  0x4e   : > { %3491 = vrot.lane.b32.xlu1 %v3490_v39, %s3601_s29  ;;  %3026 = vmatprep.subr.bf16.mxu0 %v3025_v15 }
  0x51   : > { %740 = vrot.lane.b32.xlu0 %v735_v3, %s3601_s29  ;;  %3028 = vmatpush1.bf16.msra.mxu0 %v3027_v31  ;;  %v874_v31 = vld [vmem:[%s5173_s1 + $0x278] sm:$0xff] }
  0x52   : > { %690 = vrot.lane.b32.xlu1 %v685_v9, %s5194_s24  ;;  %3030 = vmatprep.subr.bf16.mxu0 %v3029_v32  ;;  %v3045_v49 = vpack.c.bf16 %v874_v31, %v872_v28 }
  0x55   : > { %723 = vrot.lane.b32.xlu0 %v715_v47, %s3599_s27  ;;  %3032 = vmatpush1.bf16.msra.mxu0 %v3031_v40  ;;  %s3607_s27 = smov 84  }
  0x56   : > { %742 = vrot.lane.b32.xlu1 %v734_v61, %s3601_s29  ;;  %3034 = vmatprep.subr.bf16.mxu0 %v3033_v41  ;;  %v871_v41 = vld [vmem:[%s5173_s1 + $0x260] sm:$0xff] }
  0x59   : > { %692 = vrot.lane.b32.xlu0 %v684_v26, %s5194_s24 }
  0x97   : > { %v3412_v42 = vpop.permute.xlu0 %3411 }
  0x98   : > { %v3414_v45 = vunpack.i.h.bf16 %v3412_v42  ;;  %v3413_v46 = vunpack.i.l.bf16 %v3412_v42  ;;  %v3422_v47 = vpop.permute.xlu1 %3421  ;;  %v873_v42 = vld [vmem:[%s5173_s1 + $0x270] sm:$0xff] }
  0x99   : > { %v3424_v50 = vunpack.i.h.bf16 %v3422_v47  ;;  %v3423_v51 = vunpack.i.l.bf16 %v3422_v47  ;;  %v3047_v56 = vpack.c.bf16 %v873_v42, %v871_v41 }
  0x9a   : > { %v763_v58 = vsel %vm748_vm4, %v3957_v1, %v3413_v46  ;;  %v749_v61 = vsel %vm748_vm4, %v3803_v24, %v3414_v45 }
  0x9b   : > { %v3417_v18 = vpop.permute.xlu0 %3416 }
  0x9c   : > { %v3419_v52 = vunpack.i.h.bf16 %v3417_v18  ;;  %v3418_v54 = vunpack.i.l.bf16 %v3417_v18  ;;  %v3427_v19 = vpop.permute.xlu1 %3426 }
  0x9d   : > { %v3429_v26 = vunpack.i.h.bf16 %v3427_v19  ;;  %v3428_v2 = vunpack.i.l.bf16 %v3427_v19 }
  0x9e   : > { %v767_v43 = vsel %vm753_vm5, %v763_v58, %v3418_v54  ;;  %v754_v39 = vsel %vm753_vm5, %v749_v61, %v3419_v52  ;;  %v875_v61 = vld [vmem:[%s5173_s1 + $0x280] sm:$0xff] }
  0x9f   : > { %v771_v1 = vsel %vm758_vm6, %v767_v43, %v3423_v51  ;;  %v759_v3 = vsel %vm758_vm6, %v754_v39, %v3424_v50  ;;  %v3432_v5 = vpop.permute.xlu0 %3431  ;;  %v764_v10 = vsel %vm748_vm4, %v3983_v16, %v3428_v2  ;;  %v750_v11 = vsel %vm748_vm4, %v3806_v25, %v3429_v26  ;;  %v876_v50 = vld [vmem:[%s5173_s1 + $0x288] sm:$0xff]  ;;  %v878_v51 = vld [vmem:[%s5173_s1 + $0x298] sm:$0xff] }
  0xa0   : > { %1003 = vmatprep.mubr.f32.mxu0 %v771_v1  ;;  %v3434_v8 = vunpack.i.h.bf16 %v3432_v5  ;;  %v3433_v9 = vunpack.i.l.bf16 %v3432_v5  ;;  %v3437_v13 = vpop.permute.xlu1 %3436  ;;  %v3049_v0 = vpack.c.bf16 %v878_v51, %v876_v50  ;;  %v699_v2 = vrot.slane %v3803_v24, 4  ;;  %v894_v50 = vld [vmem:[%s5173_s1 + $0x318] sm:$0xff] }
  0xa1   : > { %1004 = vmatmul.mubr.f32.vlgmr.msra.gmra.mrb[0].mxu0 %v759_v3  ;;  %v3439_v14 = vunpack.i.h.bf16 %v3437_v13  ;;  %v3438_v15 = vunpack.i.l.bf16 %v3437_v13  ;;  %v700_v1 = vrot.slane %v3806_v25, 4  ;;  %v880_v3 = vld [vmem:[%s5173_s1 + $0x2a8] sm:$0xff] }
  0xa2   : > { %3036 = vmatpush1.bf16.msra.mxu0 %v3035_v62  ;;  %v768_v17 = vsel %vm753_vm5, %v764_v10, %v3433_v9  ;;  %v755_v16 = vsel %vm753_vm5, %v750_v11, %v3434_v8  ;;  %v877_v62 = vld [vmem:[%s5173_s1 + $0x290] sm:$0xff] }
  0xa3   : > { %3038 = vmatprep.subr.bf16.mxu0 %v3037_v4  ;;  %v3442_v27 = vpop.permute.xlu0 %3441  ;;  %v772_v35 = vsel %vm758_vm6, %v768_v17, %v3438_v15  ;;  %v760_v36 = vsel %vm758_vm6, %v755_v16, %v3439_v14  ;;  %v882_v4 = vld [vmem:[%s5173_s1 + $0x2b8] sm:$0xff]  ;;  %v3051_v8 = vpack.c.bf16 %v877_v62, %v875_v61  ;;  %v884_v14 = vld [vmem:[%s5173_s1 + $0x2c8] sm:$0xff]  ;;  %v701_v17 = vsel %vm698_vm3, %v699_v2, %v700_v1 }
  0xa4   : > { %v3444_v32 = vunpack.i.h.bf16 %v3442_v27  ;;  %v3443_v34 = vunpack.i.l.bf16 %v3442_v27  ;;  %v3447_v40 = vpop.permute.xlu1 %3446  ;;  %1009 = vmatprep.mubr.f32.mxu0 %v772_v35  ;;  %v3053_v37 = vpack.c.bf16 %v882_v4, %v880_v3  ;;  %v886_v15 = vld [vmem:[%s5173_s1 + $0x2d8] sm:$0xff]  ;;  %v900_v3 = vld [vmem:[%s5173_s1 + $0x348] sm:$0xff] }
  0xa5   : > { %v3449_v45 = vunpack.i.h.bf16 %v3447_v40  ;;  %v3448_v46 = vunpack.i.l.bf16 %v3447_v40  ;;  %1010 = vmatmul.mubr.f32.gmra.mrb[2].mxu0 %v760_v36  ;;  %v3057_v31 = vpack.c.bf16 %v886_v15, %v884_v14  ;;  %v890_v40 = vld [vmem:[%s5173_s1 + $0x2f8] sm:$0xff]  ;;  %v704_v14 = vrot.slane %v3858_v59, 4 }
  0xa6   : > { %3040 = vmatpush1.bf16.msra.mxu0 %v3039_v12  ;;  %v765_v47 = vsel %vm748_vm4, %v3997_v21, %v3443_v34  ;;  %v751_v48 = vsel %vm748_vm4, %v3817_v33, %v3444_v32  ;;  %v883_v32 = vld [vmem:[%s5173_s1 + $0x2c0] sm:$0xff]  ;;  %v885_v34 = vld [vmem:[%s5173_s1 + $0x2d0] sm:$0xff]  ;;  %v898_v61 = vld [vmem:[%s5173_s1 + $0x338] sm:$0xff] }
  0xa7   : > { %3042 = vmatprep.subr.bf16.mxu0 %v3041_v23  ;;  %v3452_v18 = vpop.permute.xlu0 %3451  ;;  %v769_v55 = vsel %vm753_vm5, %v765_v47, %v3448_v46  ;;  %v756_v21 = vsel %vm753_vm5, %v751_v48, %v3449_v45  ;;  %v3059_v42 = vpack.c.bf16 %v885_v34, %v883_v32  ;;  %v887_v47 = vld [vmem:[%s5173_s1 + $0x2e0] sm:$0xff]  ;;  %v889_v48 = vld [vmem:[%s5173_s1 + $0x2f0] sm:$0xff]  ;;  %v902_v4 = vld [vmem:[%s5173_s1 + $0x358] sm:$0xff] }
  0xa8   : > { %v3454_v52 = vunpack.i.h.bf16 %v3452_v18  ;;  %v3453_v54 = vunpack.i.l.bf16 %v3452_v18  ;;  %v3457_v58 = vpop.permute.xlu1 %3456  ;;  %v892_v18 = vld [vmem:[%s5173_s1 + $0x308] sm:$0xff] }
  0xa9   : > { %v3459_v19 = vunpack.i.h.bf16 %v3457_v58  ;;  %v3458_v43 = vunpack.i.l.bf16 %v3457_v58  ;;  %v896_v58 = vld [vmem:[%s5173_s1 + $0x328] sm:$0xff] }
  0xaa   : > { %3044 = vmatpush1.bf16.msra.mxu0 %v3043_v38  ;;  %v773_v39 = vsel %vm758_vm6, %v769_v55, %v3453_v54  ;;  %v761_v63 = vsel %vm758_vm6, %v756_v21, %v3454_v52  ;;  %v888_v38 = vld [vmem:[%s5173_s1 + $0x2e8] sm:$0xff]  ;;  %v3063_v52 = vpack.c.bf16 %v889_v48, %v887_v47  ;;  %v3065_v54 = vpack.c.bf16 %v894_v50, %v892_v18  ;;  %v891_v55 = vld [vmem:[%s5173_s1 + $0x300] sm:$0xff]  ;;  %v893_v21 = vld [vmem:[%s5173_s1 + $0x310] sm:$0xff] }
  0xab   : > { %3046 = vmatprep.subr.bf16.mxu0 %v3045_v49  ;;  %v3462_v26 = vpop.permute.xlu0 %3461  ;;  %1015 = vmatprep.mubr.f32.mxu0 %v773_v39  ;;  %v766_v7 = vsel %vm748_vm4, %v565_v22, %v3458_v43  ;;  %v752_v24 = vsel %vm748_vm4, %v3858_v59, %v3459_v19  ;;  %v881_v22 = vld [vmem:[%s5173_s1 + $0x2b0] sm:$0xff]  ;;  %v3061_v46 = vpack.c.bf16 %v890_v40, %v888_v38  ;;  %v907_v38 = vld [vmem:[%s5173_s1 + $0x380] sm:$0xff]  ;;  %v702_v47 = vrot.slane %v3817_v33, 4 }
  0xac   : > { %v3464_v5 = vunpack.i.h.bf16 %v3462_v26  ;;  %v3463_v6 = vunpack.i.l.bf16 %v3462_v26  ;;  %1016 = vmatmul.mubr.f32.gmra.mrb[4].mxu0 %v761_v63  ;;  %v3467_v9 = vpop.permute.xlu1 %3466  ;;  %v3055_v28 = vpack.c.bf16 %v881_v22, %v879_v60  ;;  %v3067_v19 = vpack.c.bf16 %v893_v21, %v891_v55  ;;  %v897_v26 = vld [vmem:[%s5173_s1 + $0x330] sm:$0xff]  ;;  %v911_v18 = vld [vmem:[%s5173_s1 + $0x3a0] sm:$0xff] }
  0xad   : > { %v3469_v10 = vunpack.i.h.bf16 %v3467_v9  ;;  %v3468_v11 = vunpack.i.l.bf16 %v3467_v9  ;;  %v3069_v63 = vpack.c.bf16 %v898_v61, %v896_v58  ;;  %v909_v40 = vld [vmem:[%s5173_s1 + $0x390] sm:$0xff]  ;;  %v703_v33 = vsel %vm698_vm3, %v700_v1, %v702_v47 }
  0xae   : > { %3048 = vmatpush1.bf16.msra.mxu0 %v3047_v56  ;;  %v770_v12 = vsel %vm753_vm5, %v766_v7, %v3463_v6  ;;  %v757_v13 = vsel %vm753_vm5, %v752_v24, %v3464_v5  ;;  %v913_v50 = vld [vmem:[%s5173_s1 + $0x3b0] sm:$0xff] }
  0xaf   : > { %3050 = vmatprep.subr.bf16.mxu0 %v3049_v0  ;;  %v4222_v53 = vpop.permute.xlu0 %3471  ;;  %v774_v16 = vsel %vm758_vm6, %v770_v12, %v3468_v11  ;;  %v762_v23 = vsel %vm758_vm6, %v757_v13, %v3469_v10  ;;  %v895_v0 = vld [vmem:[%s5173_s1 + $0x320] sm:$0xff]  ;;  %v3073_v10 = vpack.c.bf16 %v902_v4, %v900_v3  ;;  %v901_v12 = vld [vmem:[%s5173_s1 + $0x350] sm:$0xff]  ;;  %v3087_v21 = vpack.c.bf16 %v913_v50, %v911_v18 }
  0xb0   : > { %v718_v27 = vpop.permute.xlu1 %717  ;;  %1021 = vmatprep.mubr.f32.mxu0 %v774_v16  ;;  %v3071_v24 = vpack.c.bf16 %v897_v26, %v895_v0  ;;  %v899_v11 = vld [vmem:[%s5173_s1 + $0x340] sm:$0xff]  ;;  %v905_v16 = vld [vmem:[%s5173_s1 + $0x370] sm:$0xff]  ;;  %v917_v0 = vlaneseq }
  0xb1   : > { %v787_v36 = vsel %vm748_vm4, %v701_v17, %v718_v27  ;;  %1022 = vmatmul.mubr.f32.gmra.mrb[6].mxu0 %v762_v23  ;;  %v3075_v22 = vpack.c.bf16 %v901_v12, %v899_v11  ;;  %v903_v17 = vld [vmem:[%s5173_s1 + $0x360] sm:$0xff]  ;;  %v908_v27 = vld [vmem:[%s5173_s1 + $0x388] sm:$0xff] }
  0xb2   : > { %3052 = vmatpush1.bf16.msra.mxu0 %v3051_v8  ;;  %v3079_v32 = vpack.c.bf16 %v905_v16, %v903_v17  ;;  %v4379_v26 = vshrl.u32 %v917_v0, 7  ;;  %v915_v3 = vld [vmem:[%s5174_s2] sm:$0x3] }
  0xb3   : > { %3054 = vmatprep.subr.bf16.mxu0 %v3053_v37  ;;  %v4241_v35 = vpop.permute.xlu0 %3476 }
  0xb4   : > { %v737_v41 = vpop.permute.xlu1 %736  ;;  %v3479_v61 = vunpack.i.h.bf16 %v4241_v35  ;;  %v923_v4 = vsub.s32 1, %v4379_v26 }
  0xb5   : > { %v791_v45 = vsel %vm753_vm5, %v787_v36, %v737_v41  ;;  %v912_v41 = vld [vmem:[%s5173_s1 + $0x3a8] sm:$0xff] }
  0xb6   : > { %3056 = vmatpush1.bf16.msra.mxu0 %v3055_v28  ;;  %2590 = vmatprep.mubr.msk.f32.mxu0 %vm758_vm6, %v791_v45  ;;  %v910_v28 = vld [vmem:[%s5173_s1 + $0x398] sm:$0xff]  ;;  %v3473_v45 = vunpack.i.l.bf16 %v4222_v53 }
  0xb7   : > { %3058 = vmatprep.subr.bf16.mxu0 %v3057_v31  ;;  %v4257_v49 = vpop.permute.xlu0 %3481  ;;  %v3081_v36 = vpack.c.bf16 %v910_v28, %v908_v27 }
  0xb8   : > { %v4266_v51 = vpop.permute.xlu1 %719  ;;  %v775_v55 = vsel %vm748_vm4, %v3992_v30, %v3473_v45  ;;  %v3483_v58 = vunpack.i.l.bf16 %v4257_v49  ;;  %v3484_v25 = vunpack.i.h.bf16 %v4257_v49 }
  0xba   : > { %3060 = vmatpush1.bf16.msra.mxu0 %v3059_v42  ;;  %v914_v42 = vld [vmem:[%s5173_s1 + $0x3b8] sm:$0xff] }
  0xbb   : > { %3062 = vmatprep.subr.bf16.mxu0 %v3061_v46  ;;  %v4274_v56 = vpop.permute.xlu0 %738  ;;  %v3083_v46 = vpack.c.bf16 %v909_v40, %v907_v38  ;;  %v3085_v48 = vpack.c.bf16 %v914_v42, %v912_v41  ;;  %v1162_v40 = vld [vmem:[%s5175_s3] sm:$0xff] }
  0xbc   : > { %v3487_v62 = vpop.permute.xlu1 %3486  ;;  %2768 = vmatprep.mubr.msk.f32.mxu1 %vm1164_vm7, %v1162_v40 }
  0xbd   : > { %v3489_v43 = vunpack.i.h.bf16 %v3487_v62  ;;  %v3488_v39 = vunpack.i.l.bf16 %v3487_v62 }
  0xbe   : > { %3064 = vmatpush1.bf16.msra.mxu0 %v3063_v52  ;;  %v3478_v52 = vunpack.i.l.bf16 %v4241_v35 }
  0xbf   : > { %3066 = vmatprep.subr.bf16.mxu0 %v3065_v54  ;;  %v4288_v2 = vpop.permute.xlu0 %721  ;;  %v777_v5 = vsel %vm748_vm4, %v4108_v29, %v3488_v39  ;;  %v778_v6 = vsel %vm748_vm4, %v634_v20, %v3489_v43  ;;  %v906_v20 = vld [vmem:[%s5173_s1 + $0x378] sm:$0xff]  ;;  %v3474_v54 = vunpack.i.h.bf16 %v4222_v53  ;;  %v705_v53 = vsel %vm698_vm3, %v702_v47, %v704_v14 }
  0xc0   : > { %v3492_v7 = vpop.permute.xlu1 %3491  ;;  %v3077_v15 = vpack.c.bf16 %v906_v20, %v904_v44  ;;  %v779_v62 = vsel %vm753_vm5, %v775_v55, %v3478_v52  ;;  %v789_v39 = vsel %vm748_vm4, %v705_v53, %v4288_v2  ;;  %v919_v2 = vsub.s32 0, %v4379_v26 }
  0xc1   : > { %v3494_v8 = vunpack.i.h.bf16 %v3492_v7  ;;  %v3493_v9 = vunpack.i.l.bf16 %v3492_v7  ;;  %v776_v30 = vsel %vm748_vm4, %v4040_v57, %v3474_v54  ;;  %v783_v1 = vsel %vm758_vm6, %v779_v62, %v3483_v58 }
  0xc2   : > { %3068 = vmatpush1.bf16.msra.mxu0 %v3067_v19  ;;  %v788_v19 = vsel %vm748_vm4, %v703_v33, %v4266_v51  ;;  %v780_v35 = vsel %vm753_vm5, %v776_v30, %v3479_v61  ;;  %v3611_v26 = vmov 0.0  }
  0xc3   : > { %3070 = vmatprep.subr.bf16.mxu0 %v3069_v63  ;;  %v741_v29 = vpop.permute.xlu0 %740  ;;  %v781_v13 = vsel %vm753_vm5, %v777_v5, %v3493_v9  ;;  %v782_v37 = vsel %vm753_vm5, %v778_v6, %v3494_v8  ;;  %v792_v43 = vsel %vm753_vm5, %v788_v19, %v4274_v56  ;;  %v784_v51 = vsel %vm758_vm6, %v780_v35, %v3484_v25 }
  0xc4   : > { %v691_v60 = vpop.permute.xlu1 %690  ;;  %v793_v57 = vsel %vm753_vm5, %v789_v39, %v741_v29  ;;  %v920_v5 = vrot.slane %v915_v3, %v919_v2  ;;  %v924_v6 = vrot.slane %v915_v3, %v923_v4  ;;  %v1163_v39 = vld [vmem:[%s5175_s3 + $0x8] sm:$0x3f] }
  0xc5   : > { %v785_v49 = vsel %vm758_vm6, %v781_v13, %v691_v60 }
  0xc6   : > { %3072 = vmatpush1.bf16.msra.mxu0 %v3071_v24 }
  0xc7   : > { %3074 = vmatprep.subr.bf16.mxu0 %v3073_v10  ;;  %v724_v23 = vpop.permute.xlu0 %723 }
  0xc8   : > { %v790_v59 = vsel %vm748_vm4, %v704_v14, %v724_v23  ;;  %v743_v31 = vpop.permute.xlu1 %742  ;;  %vm1369_vm4 = vcmask 326656  }
  0xc9   : > { %v794_v34 = vsel %vm753_vm5, %v790_v59, %v743_v31  ;;  %vm1372_vm5 = vcmask 441344  }
  0xca   : > { %3076 = vmatpush1.bf16.msra.mxu0 %v3075_v22 }
  0xcb   : > { %3078 = vmatprep.subr.bf16.mxu0 %v3077_v15  ;;  %v693_v63 = vpop.permute.xlu0 %692 }
  0xcc   : > { %v786_v56 = vsel %vm758_vm6, %v782_v37, %v693_v63 }
  0xce   : > { %3080 = vmatpush1.bf16.msra.mxu0 %v3079_v32 }
  0xcf   : > { %3082 = vmatprep.subr.bf16.mxu0 %v3081_v36 }
  0xd2   : > { %3084 = vmatpush1.bf16.msra.mxu0 %v3083_v46 }
  0xd3   : > { %3086 = vmatprep.subr.bf16.mxu0 %v3085_v48 }
  0xd6   : > { %3088 = vmatpush1.bf16.msra.mxu0 %v3087_v21 }
  0xd9   : > { %1093 = vmatmul.mubr.f32.vlgmr.msra.gmra.mrb[0].mxu0 %v783_v1 }
  0xda   : > { %2591 = vmatprep.mubr.msk.f32.mxu0 %vm758_vm6, %v792_v43 }
  0xdd   : > { %1099 = vmatmul.mubr.f32.gmra.mrb[2].mxu0 %v784_v51  ;;  %v1249_v51 = vld [vmem:[%s5176_s4] sm:$0xff] }
  0xde   : > { %2592 = vmatprep.mubr.msk.f32.mxu0 %vm758_vm6, %v793_v57  ;;  %v1250_v57 = vld [vmem:[%s5176_s4 + $0x8] sm:$0x3f] }
  0xe1   : > { %1105 = vmatmul.mubr.f32.gmra.mrb[4].mxu0 %v785_v49 }
  0xe2   : > { %2593 = vmatprep.mubr.msk.f32.mxu0 %vm758_vm6, %v794_v34 }
  0xe5   : > { %1111 = vmatmul.mubr.f32.gmra.mrb[6].mxu0 %v786_v56 }
 0x1ac   : > { %v1094_v7 = vpop.f32.mrb[0].mxu0 }
 0x1ad   : > { %v3332_v24 = vadd.f32 %v1094_v7, %v920_v5  ;;  %v1096_v8 = vpop.f32.mrb[1].mxu0 }
 0x1ae   : > { %v3333_v9 = vadd.f32 %v1096_v8, %v924_v6 }
 0x1af   : > { %v1117_v10 = vmax.f32 %v3332_v24, 0.0 }
 0x1b0   : > { %v1118_v11 = vmax.f32 %v3333_v9, 0.0  ;;  %v1100_v12 = vpop.f32.mrb[2].mxu0 }
 0x1b1   : > { %v3334_v29 = vadd.f32 %v1100_v12, %v920_v5  ;;  %v1102_v44 = vpop.f32.mrb[3].mxu0 }
 0x1b2   : > { %v3495_v20 = vpack.i.bf16 %v1118_v11, %v1117_v10  ;;  %v3335_v13 = vadd.f32 %v1102_v44, %v924_v6  ;;  %v1453_v44 = vld [vmem:[%s5177_s5 + $0x18] sm:$0xff] }
 0x1b3   : > { %v1119_v37 = vmax.f32 %v3334_v29, 0.0  ;;  %v1451_v29 = vld [vmem:[%s5177_s5 + $0x8] sm:$0xff] }
 0x1b4   : > { %v1120_v60 = vmax.f32 %v3335_v13, 0.0  ;;  %v1106_v22 = vpop.f32.mrb[4].mxu0  ;;  %3496 = vrot.lane.b32.xlu1 %v3495_v20, %s3602_s17  ;;  %v1450_v20 = vld [vmem:[%s5177_s5] sm:$0xff]  ;;  %v3109_v13 = vpack.c.bf16 %v1453_v44, %v1451_v29  ;;  %v1488_v29 = vld [vmem:[%s5177_s5 + $0x130] sm:$0xff]  ;;  %v1491_v44 = vld [vmem:[%s5177_s5 + $0x148] sm:$0xff] }
 0x1b5   : > { %v3336_v14 = vadd.f32 %v1106_v22, %v920_v5  ;;  %v1108_v15 = vpop.f32.mrb[5].mxu0  ;;  %v1457_v22 = vld [vmem:[%s5177_s5 + $0x38] sm:$0xff] }
 0x1b6   : > { %v3500_v17 = vpack.i.bf16 %v1120_v60, %v1119_v37  ;;  %v3337_v16 = vadd.f32 %v1108_v15, %v924_v6  ;;  %v1455_v60 = vld [vmem:[%s5177_s5 + $0x28] sm:$0xff] }
 0x1b7   : > { %v1121_v23 = vmax.f32 %v3336_v14, 0.0  ;;  %v3113_v15 = vpack.c.bf16 %v1457_v22, %v1455_v60  ;;  %v1490_v60 = vld [vmem:[%s5177_s5 + $0x140] sm:$0xff]  ;;  %v1492_v22 = vld [vmem:[%s5177_s5 + $0x150] sm:$0xff] }
 0x1b8   : > { %v1122_v27 = vmax.f32 %v3337_v16, 0.0  ;;  %v1112_v28 = vpop.f32.mrb[6].mxu0  ;;  %3501 = vrot.lane.b32.xlu0 %v3500_v17, %s3602_s17  ;;  %v1454_v17 = vld [vmem:[%s5177_s5 + $0x20] sm:$0xff]  ;;  %v1456_v16 = vld [vmem:[%s5177_s5 + $0x30] sm:$0xff] }
 0x1b9   : > { %v3338_v59 = vadd.f32 %v1112_v28, %v920_v5  ;;  %v1114_v31 = vpop.f32.mrb[7].mxu0  ;;  %v3115_v28 = vpack.c.bf16 %v1456_v16, %v1454_v17  ;;  %v3151_v17 = vpack.c.bf16 %v1492_v22, %v1490_v60 }
 0x1ba   : > { %v3505_v32 = vpack.i.bf16 %v1122_v27, %v1121_v23  ;;  %v3339_v34 = vadd.f32 %v1114_v31, %v924_v6  ;;  %v1461_v27 = vld [vmem:[%s5177_s5 + $0x58] sm:$0xff]  ;;  %v1458_v31 = vld [vmem:[%s5177_s5 + $0x40] sm:$0xff] }
 0x1bb   : > { %v1123_v36 = vmax.f32 %v3338_v59, 0.0 }
 0x1bc   : > { %v1124_v38 = vmax.f32 %v3339_v34, 0.0  ;;  %3506 = vrot.lane.b32.xlu1 %v3505_v32, %s3602_s17  ;;  %v1460_v32 = vld [vmem:[%s5177_s5 + $0x50] sm:$0xff]  ;;  %v1463_v34 = vld [vmem:[%s5177_s5 + $0x68] sm:$0xff] }
 0x1be   : > { %v3510_v41 = vpack.i.bf16 %v1124_v38, %v1123_v36  ;;  %v3119_v38 = vpack.c.bf16 %v1460_v32, %v1458_v31 }
 0x1c0   : > { %3511 = vrot.lane.b32.xlu0 %v3510_v41, %s3602_s17  ;;  %s3606_s17 = smov 112   ;;  %v1462_v41 = vld [vmem:[%s5177_s5 + $0x60] sm:$0xff] }
 0x226   : > { %v3497_v42 = vpop.permute.xlu1 %3496 }
 0x227   : > { %v3499_v45 = vunpack.i.h.bf16 %v3497_v42  ;;  %v3498_v46 = vunpack.i.l.bf16 %v3497_v42  ;;  %v1464_v42 = vld [vmem:[%s5177_s5 + $0x70] sm:$0xff] }
 0x229   : > { %v1150_v48 = vsel %vm1149_vm8, %v3498_v46, %v3499_v45  ;;  %v1467_v45 = vld [vmem:[%s5177_s5 + $0x88] sm:$0xff]  ;;  %v1469_v46 = vld [vmem:[%s5177_s5 + $0x98] sm:$0xff] }
 0x22a   : > { %v3502_v47 = vpop.permute.xlu0 %3501  ;;  %v1158_v54 = vmax.f32 %v1117_v10, %v1150_v48  ;;  %v3125_v48 = vpack.c.bf16 %v1469_v46, %v1467_v45  ;;  %v1502_v45 = vld [vmem:[%s5177_s5 + $0x1a0] sm:$0xff]  ;;  %v1504_v46 = vld [vmem:[%s5177_s5 + $0x1b0] sm:$0xff] }
 0x22b   : > { %v3504_v18 = vunpack.i.h.bf16 %v3502_v47  ;;  %v3503_v50 = vunpack.i.l.bf16 %v3502_v47  ;;  %v3123_v47 = vpack.c.bf16 %v1464_v42, %v1462_v41 }
 0x22d   : > { %v1151_v52 = vsel %vm1149_vm8, %v3503_v50, %v3504_v18  ;;  %v1466_v18 = vld [vmem:[%s5177_s5 + $0x80] sm:$0xff]  ;;  %v1468_v50 = vld [vmem:[%s5177_s5 + $0x90] sm:$0xff] }
 0x22e   : > { %v1159_v55 = vmax.f32 %v1119_v37, %v1151_v52  ;;  %v3507_v21 = vpop.permute.xlu1 %3506  ;;  %v1452_v37 = vld [vmem:[%s5177_s5 + $0x10] sm:$0xff]  ;;  %v1471_v52 = vld [vmem:[%s5177_s5 + $0xa8] sm:$0xff] }
 0x22f   : > { %v3509_v33 = vunpack.i.h.bf16 %v3507_v21  ;;  %v3508_v58 = vunpack.i.l.bf16 %v3507_v21  ;;  %v3111_v14 = vpack.c.bf16 %v1452_v37, %v1450_v20  ;;  %v1493_v20 = vld [vmem:[%s5177_s5 + $0x158] sm:$0xff] }
 0x230   : > { %v3089_v61 = vpack.c.bf16 %v1159_v55, %v1158_v54  ;;  %v1473_v54 = vld [vmem:[%s5177_s5 + $0xb8] sm:$0xff]  ;;  %v3127_v55 = vpack.c.bf16 %v1468_v50, %v1466_v18  ;;  %v3149_v37 = vpack.c.bf16 %v1493_v20, %v1491_v44  ;;  %v3163_v18 = vpack.c.bf16 %v1504_v46, %v1502_v45 }
 0x231   : > { %v1152_v19 = vsel %vm1149_vm8, %v3508_v58, %v3509_v33  ;;  %v3129_v21 = vpack.c.bf16 %v1473_v54, %v1471_v52  ;;  %v1470_v33 = vld [vmem:[%s5177_s5 + $0xa0] sm:$0xff]  ;;  %v1472_v58 = vld [vmem:[%s5177_s5 + $0xb0] sm:$0xff] }
 0x232   : > { %v3512_v62 = vpop.permute.xlu0 %3511  ;;  %3090 = vmatprep.subr.bf16.mxu1 %v3089_v61  ;;  %v1160_v1 = vmax.f32 %v1121_v23, %v1152_v19  ;;  %v1459_v23 = vld [vmem:[%s5177_s5 + $0x48] sm:$0xff]  ;;  %v3131_v19 = vpack.c.bf16 %v1472_v58, %v1470_v33  ;;  %v1506_v52 = vld [vmem:[%s5177_s5 + $0x1c0] sm:$0xff]  ;;  %v1508_v54 = vld [vmem:[%s5177_s5 + $0x1d0] sm:$0xff] }
 0x233   : > { %v3514_v30 = vunpack.i.h.bf16 %v3512_v62  ;;  %v3513_v53 = vunpack.i.l.bf16 %v3512_v62  ;;  %3092 = vmatpush3.bf16.msra.mxu1 %v3089_v61  ;;  %v3117_v59 = vpack.c.bf16 %v1461_v27, %v1459_v23  ;;  %v1477_v62 = vld [vmem:[%s5177_s5 + $0xd8] sm:$0xff]  ;;  %v1494_v23 = vld [vmem:[%s5177_s5 + $0x160] sm:$0xff]  ;;  %v1496_v27 = vld [vmem:[%s5177_s5 + $0x170] sm:$0xff]  ;;  %v3167_v33 = vpack.c.bf16 %v1508_v54, %v1506_v52 }
 0x234   : > { %v3155_v31 = vpack.c.bf16 %v1496_v27, %v1494_v23 }
 0x235   : > { %v1153_v25 = vsel %vm1149_vm8, %v3513_v53, %v3514_v30  ;;  %v1474_v53 = vld [vmem:[%s5177_s5 + $0xc0] sm:$0xff]  ;;  %vm1378_vm8 = vcmask 670720  }
 0x236   : > { %v1161_v43 = vmax.f32 %v1123_v36, %v1153_v25  ;;  %v1465_v36 = vld [vmem:[%s5177_s5 + $0x78] sm:$0xff]  ;;  %v1476_v25 = vld [vmem:[%s5177_s5 + $0xd0] sm:$0xff] }
 0x237   : > { %v3121_v40 = vpack.c.bf16 %v1465_v36, %v1463_v34  ;;  %v1498_v34 = vld [vmem:[%s5177_s5 + $0x180] sm:$0xff]  ;;  %v1500_v36 = vld [vmem:[%s5177_s5 + $0x190] sm:$0xff] }
 0x238   : > { %v3093_v35 = vpack.c.bf16 %v1161_v43, %v1160_v1  ;;  %v1479_v1 = vld [vmem:[%s5177_s5 + $0xe8] sm:$0xff]  ;;  %v1481_v43 = vld [vmem:[%s5177_s5 + $0xf8] sm:$0xff]  ;;  %v3159_v41 = vpack.c.bf16 %v1500_v36, %v1498_v34 }
 0x23a   : > { %3095 = vmatprep.subr.msk.bf16.mxu1 %vm3094_vm10, %v3093_v35 }
 0x23b   : > { %3098 = vmatpush3.bf16.msk.msra.mxu1 %vm3094_vm10, %v3093_v35 }
 0x23c   : > { %3100 = vmatprep.subr.bf16.mxu1 %v3089_v61 }
 0x23e   : > { %2769 = vmatmul.mubr.msk.f32.vlgmr.msra.gmra.mrb[0].mxu1 %vm1164_vm7, %v1163_v39  ;;  %v3137_v39 = vpack.c.bf16 %v1481_v43, %v1479_v1 }
 0x23f   : > { %3102 = vmatpush3.bf16.msra.mxu1 %v3089_v61  ;;  %2779 = vmatprep.mubr.msk.f32.mxu1 %vm1164_vm7, %v1249_v51  ;;  %v1475_v61 = vld [vmem:[%s5177_s5 + $0xc8] sm:$0xff]  ;;  %v1478_v51 = vld [vmem:[%s5177_s5 + $0xe0] sm:$0xff] }
 0x240   : > { %3105 = vmatprep.subr.msk.bf16.mxu1 %vm3094_vm10, %v3093_v35  ;;  %v3133_v30 = vpack.c.bf16 %v1477_v62, %v1475_v61  ;;  %v1510_v61 = vld [vmem:[%s5177_s5 + $0x1e0] sm:$0xff]  ;;  %v1512_v62 = vld [vmem:[%s5177_s5 + $0x1f0] sm:$0xff] }
 0x243   : > { %3108 = vmatpush3.bf16.msk.msra.mxu1 %vm3094_vm10, %v3093_v35  ;;  %v3135_v35 = vpack.c.bf16 %v1476_v25, %v1474_v53  ;;  %v1515_v53 = vld [vmem:[%s5177_s5 + $0x208] sm:$0xff]  ;;  %v1517_v25 = vld [vmem:[%s5177_s5 + $0x218] sm:$0xff]  ;;  %vm1749_vm10 = vcmask 392192  }
 0x244   : > { %3110 = vmatprep.subr.bf16.mxu1 %v3109_v13  ;;  %v3173_v43 = vpack.c.bf16 %v1517_v25, %v1515_v53 }
 0x246   : > { %2780 = vmatmul.mubr.msk.f32.vlgmr.msra.gmra.mrb[2].mxu1 %vm1164_vm7, %v1250_v57  ;;  %v1480_v57 = vld [vmem:[%s5177_s5 + $0xf0] sm:$0xff] }
 0x247   : > { %3112 = vmatpush1.bf16.msra.mxu1 %v3111_v14  ;;  %v1495_v14 = vld [vmem:[%s5177_s5 + $0x168] sm:$0xff] }
 0x248   : > { %3114 = vmatprep.subr.bf16.mxu1 %v3113_v15  ;;  %v1497_v15 = vld [vmem:[%s5177_s5 + $0x178] sm:$0xff] }
 0x249   : > { %v3153_v16 = vpack.c.bf16 %v1497_v15, %v1495_v14 }
 0x24b   : > { %3116 = vmatpush1.bf16.msra.mxu1 %v3115_v28  ;;  %v1499_v28 = vld [vmem:[%s5177_s5 + $0x188] sm:$0xff] }
 0x24c   : > { %3118 = vmatprep.subr.bf16.mxu1 %v3117_v59  ;;  %v1501_v59 = vld [vmem:[%s5177_s5 + $0x198] sm:$0xff] }
 0x24d   : > { %v3157_v32 = vpack.c.bf16 %v1501_v59, %v1499_v28 }
 0x24f   : > { %3120 = vmatpush1.bf16.msra.mxu1 %v3119_v38  ;;  %v1503_v38 = vld [vmem:[%s5177_s5 + $0x1a8] sm:$0xff] }
 0x250   : > { %3122 = vmatprep.subr.bf16.mxu1 %v3121_v40  ;;  %v1505_v40 = vld [vmem:[%s5177_s5 + $0x1b8] sm:$0xff] }
 0x251   : > { %v3161_v42 = vpack.c.bf16 %v1505_v40, %v1503_v38 }
 0x253   : > { %3124 = vmatpush1.bf16.msra.mxu1 %v3123_v47  ;;  %v1507_v47 = vld [vmem:[%s5177_s5 + $0x1c8] sm:$0xff] }
 0x254   : > { %3126 = vmatprep.subr.bf16.mxu1 %v3125_v48  ;;  %v1509_v48 = vld [vmem:[%s5177_s5 + $0x1d8] sm:$0xff] }
 0x255   : > { %v3165_v50 = vpack.c.bf16 %v1509_v48, %v1507_v47  ;;  %v1514_v47 = vld [vmem:[%s5177_s5 + $0x200] sm:$0xff]  ;;  %v1519_v48 = vld [vmem:[%s5177_s5 + $0x228] sm:$0xff] }
 0x257   : > { %3128 = vmatpush1.bf16.msra.mxu1 %v3127_v55  ;;  %v1511_v55 = vld [vmem:[%s5177_s5 + $0x1e8] sm:$0xff] }
 0x258   : > { %3130 = vmatprep.subr.bf16.mxu1 %v3129_v21  ;;  %v1513_v21 = vld [vmem:[%s5177_s5 + $0x1f8] sm:$0xff] }
 0x259   : > { %v3169_v58 = vpack.c.bf16 %v1513_v21, %v1511_v55 }
 0x25b   : > { %3132 = vmatpush1.bf16.msra.mxu1 %v3131_v19  ;;  %v3171_v19 = vpack.c.bf16 %v1512_v62, %v1510_v61  ;;  %v1523_v61 = vld [vmem:[%s5177_s5 + $0x248] sm:$0xff]  ;;  %v1525_v62 = vld [vmem:[%s5177_s5 + $0x258] sm:$0xff] }
 0x25c   : > { %3134 = vmatprep.subr.bf16.mxu1 %v3133_v30  ;;  %v3181_v25 = vpack.c.bf16 %v1525_v62, %v1523_v61 }
 0x25f   : > { %3136 = vmatpush1.bf16.msra.mxu1 %v3135_v35 }
 0x260   : > { %3138 = vmatprep.subr.bf16.mxu1 %v3137_v39 }
 0x311   : > { %v2770_v49 = vpop.f32.mrb[0].mxu1 }
 0x312   : > { %v1240_v63 = vpop.f32.mrb[1].mxu1 }
 0x319   : > { %v2781_v56 = vpop.f32.mrb[2].mxu1 }
 0x31a   : > { %v4412_v0 = vmax.f32 %v2770_v49, %v2781_v56  ;;  %v1323_v3 = vpop.f32.mrb[3].mxu1  ;;  %v1483_v49 = vld [vmem:[%s5177_s5 + $0x108] sm:$0xff]  ;;  %v3139_v56 = vpack.c.bf16 %v1480_v57, %v1478_v51 }
 0x31b   : > { %v4414_v5 = vmax.f32 %v1240_v63, %v1323_v3  ;;  %v1485_v63 = vld [vmem:[%s5177_s5 + $0x118] sm:$0xff] }
 0x31c   : > { %v1337_v6 = vrot.slane %v4412_v0, 1  ;;  %v4422_v9 = vrot.slane %v4412_v0, 2  ;;  %v3141_v3 = vpack.c.bf16 %v1485_v63, %v1483_v49  ;;  %3140 = vmatpush1.bf16.msra.mxu1 %v3139_v56 }
 0x31d   : > { %v1336_v7 = vrot.slane %v4414_v5, 1  ;;  %v3515_v24 = vpack.i.bf16 %v4412_v0, %v4414_v5  ;;  %v1345_v8 = vrot.slane %v4414_v5, 2 }
 0x31e   : > { %3142 = vmatprep.subr.bf16.mxu1 %v3141_v3 }
 0x31f   : > { %3516 = vrot.lane.b32.xlu1 %v3515_v24, %s3604_s30  ;;  %v1338_v10 = vsel %vm540_vm0, %v1336_v7, %v1337_v6  ;;  %v1347_v12 = vsel %vm590_vm1, %v1345_v8, %v4422_v9  ;;  %v1484_v7 = vld [vmem:[%s5177_s5 + $0x110] sm:$0xff]  ;;  %v1487_v24 = vld [vmem:[%s5177_s5 + $0x128] sm:$0xff]  ;;  %v1489_v8 = vld [vmem:[%s5177_s5 + $0x138] sm:$0xff]  ;;  %vm1360_vm0 = vcmask 916480   ;;  %s485_s30 = sand.u32 1, %s3589_s19  }
 0x320   : > { %v3520_v11 = vpack.i.bf16 %v1337_v6, %v1338_v10  ;;  %s2518_s20 = scalar_lea.sflag [#allocation3], %s485_s30 }
 0x322   : > { %3521 = vrot.lane.b32.xlu0 %v3520_v11, %s3605_s16  ;;  %v3145_v11 = vpack.c.bf16 %v1489_v8, %v1487_v24 }
 0x323   : > { %1393 = vrot.lane.b32.xlu1 %v1347_v12, %s3606_s17 }
 0x326   : > { %1395 = vrot.lane.b32.xlu0 %v4422_v9, %s3606_s17  ;;  %s486_s17 = scalar_lea.vmem [#allocation2], %s485_s30 }
 0x327   : > { %1339 = vrot.lane.b32.xlu1 %v1338_v10, %s3607_s27  ;;  %s2530_s29 = sshll.u32 %s486_s17, 4  ;;  %s5132_s29 = int_to_ptr.vmem [resolvable:$true] %s2530_s29 }
 0x328   : > { %s3535_s18 = scalar_lea.vmem %s5132_s29, 16 }
 0x329   : > { %p3536_p11 = scmp.ne.s32.totalorder %s5132_s29, %s3535_s18 }
 0x32a   : > { %1348 = vrot.lane.b32.xlu0 %v1347_v12, %s5196_s23  ;;  %v1486_v12 = vld [vmem:[%s5177_s5 + $0x120] sm:$0xff]  ;;  %s2656_s23 = sshll.u32 %s3715_s22, 4  ;;  %s3613_s22 = smov [#allocation2]  }
 0x32b   : > { %v3147_v13 = vpack.c.bf16 %v1488_v29, %v1486_v12  ;;  %p3537_p12 = pnand %p3536_p11, %p3732_p5 }
 0x32d   : > { %p3538_p13 = pneg %p3537_p12 }
 0x32e   : > { %1341 = vrot.lane.b32.xlu0 %v1337_v6, %s3607_s27  ;;  %v1482_v6 = vld [vmem:[%s5177_s5 + $0x100] sm:$0xff]  ;;  %s3539_s27 = sshll.u32 %s3613_s22, 4  ;;  %s3540_s27 = int_to_ptr.vmem [resolvable:$false] %s3539_s27 }
 0x32f   : > { %v3143_v10 = vpack.c.bf16 %v1484_v7, %v1482_v6  ;;  %s3541_s24 = scalar_lea.vmem %s3540_s27, 32  ;;  %p3542_p0 = scmp.lt.s32.totalorder %s5132_s29, %s3540_s27 }
 0x330   : > { %p3543_p1 = scmp.lt.s32.totalorder %s3541_s24, %s3535_s18 }
 0x331   : > { %3144 = vmatpush1.bf16.msra.mxu1 %v3143_v10 }
 0x332   : > { %3146 = vmatprep.subr.bf16.mxu1 %v3145_v11  ;;  %p3544_p2 = por %p3543_p1, %p3542_p0 }
 0x334   : > { %p3545_p3 = pnand %p3544_p2, %p3538_p13 }
 0x335   : > { %3148 = vmatpush1.bf16.msra.mxu1 %v3147_v13 }
 0x336   : > { %3150 = vmatprep.subr.bf16.mxu1 %v3149_v37 }
 0x339   : > { %3152 = vmatpush1.bf16.msra.mxu1 %v3151_v17 }
 0x33a   : > { %3154 = vmatprep.subr.bf16.mxu1 %v3153_v16 }
 0x33d   : > { %3156 = vmatpush1.bf16.msra.mxu1 %v3155_v31 }
 0x33e   : > { %3158 = vmatprep.subr.bf16.mxu1 %v3157_v32 }
 0x341   : > { %3160 = vmatpush1.bf16.msra.mxu1 %v3159_v41 }
 0x342   : > { %3162 = vmatprep.subr.bf16.mxu1 %v3161_v42 }
 0x345   : > { %3164 = vmatpush1.bf16.msra.mxu1 %v3163_v18  ;;  %v1521_v18 = vld [vmem:[%s5177_s5 + $0x238] sm:$0xff] }
 0x346   : > { %3166 = vmatprep.subr.bf16.mxu1 %v3165_v50  ;;  %v3177_v21 = vpack.c.bf16 %v1521_v18, %v1519_v48 }
 0x349   : > { %3168 = vmatpush1.bf16.msra.mxu1 %v3167_v33  ;;  %v1518_v33 = vld [vmem:[%s5177_s5 + $0x220] sm:$0xff] }
 0x34a   : > { %3170 = vmatprep.subr.bf16.mxu1 %v3169_v58  ;;  %v1520_v58 = vld [vmem:[%s5177_s5 + $0x230] sm:$0xff] }
 0x34d   : > { %3172 = vmatpush1.bf16.msra.mxu1 %v3171_v19 }
 0x34e   : > { %3174 = vmatprep.subr.bf16.mxu1 %v3173_v43  ;;  %v1524_v43 = vld [vmem:[%s5177_s5 + $0x250] sm:$0xff] }
 0x391   : > { %v3517_v30 = vpop.permute.xlu1 %3516 }
 0x392   : > { %v3519_v35 = vunpack.i.h.bf16 %v3517_v30  ;;  %v3518_v39 = vunpack.i.l.bf16 %v3517_v30  ;;  %v3179_v30 = vpack.c.bf16 %v1520_v58, %v1518_v33  ;;  %v1554_v33 = vld [vmem:[%s5177_s5 + $0x340] sm:$0xf] }
 0x394   : > { %v3522_v1 = vpop.permute.xlu0 %3521 }
 0x395   : > { %v3524_v51 = vunpack.i.h.bf16 %v3522_v1  ;;  %v3523_v57 = vunpack.i.l.bf16 %v3522_v1  ;;  %v1394_v49 = vpop.permute.xlu1 %1393  ;;  %v1522_v1 = vld [vmem:[%s5177_s5 + $0x240] sm:$0xff] }
 0x396   : > { %v1431_v41 = vrot.slane %v1394_v49, 2 }
 0x397   : > { %v1399_v63 = vsel %vm1164_vm7, %v3518_v39, %v3523_v57  ;;  %v1400_v56 = vsel %vm1164_vm7, %v3519_v35, %v3524_v51  ;;  %vm1375_vm7 = vcmask 556032   ;;  %v1527_v39 = vld [vmem:[%s5177_s5 + $0x268] sm:$0xff] }
 0x398   : > { %v1402_v3 = vsel %vm1401_vm11, %v1399_v63, %v3523_v57  ;;  %v1396_v6 = vpop.permute.xlu0 %1395  ;;  %v1403_v7 = vsel %vm1401_vm11, %v1400_v56, %v3524_v51  ;;  %v3183_v56 = vpack.c.bf16 %v1524_v43, %v1522_v1  ;;  %vm1761_vm11 = vcmask 1041408  }
 0x399   : > { %v1405_v24 = vsel %vm1404_vm12, %v1402_v3, %v3523_v57  ;;  %v1406_v8 = vsel %vm1404_vm12, %v1403_v7, %v3524_v51  ;;  %v1340_v10 = vpop.permute.xlu1 %1339  ;;  %v1432_v36 = vrot.slane %v1396_v6, 2  ;;  %v1526_v7 = vld [vmem:[%s5177_s5 + $0x260] sm:$0xff]  ;;  %vm3215_vm12 = vmpackc.low %vm1761_vm11, %vm3603_vm9  ;;  %vm1933_vm9 = vcmask 654336  }
 0x39a   : > { %v1408_v11 = vsel %vm1407_vm14, %v1405_v24, %v3523_v57  ;;  %v1409_v12 = vsel %vm1407_vm14, %v1406_v8, %v3524_v51  ;;  %v1355_v29 = vsel %vm1354_vm13, %v4414_v5, %v1340_v10  ;;  %v1528_v24 = vld [vmem:[%s5177_s5 + $0x270] sm:$0xff]  ;;  %v1531_v8 = vld [vmem:[%s5177_s5 + $0x288] sm:$0xff]  ;;  %vm1757_vm14 = vcmask 80896  }
 0x39b   : > { %v1410_v44 = vsel %vm1354_vm13, %v1408_v11, %v3523_v57  ;;  %v1411_v20 = vsel %vm1354_vm13, %v1409_v12, %v3524_v51  ;;  %v1358_v13 = vsel %vm1357_vm15, %v1355_v29, %v1340_v10  ;;  %v1433_v42 = vsel %vm590_vm1, %v1431_v41, %v1432_v36  ;;  %v1549_v41 = vld [vmem:[%s5177_s5 + $0x318] sm:$0xff] }
 0x39c   : > { %v1412_v37 = vsel %vm1357_vm15, %v1410_v44, %v3523_v57  ;;  %v1413_v60 = vsel %vm1357_vm15, %v1411_v20, %v3524_v51  ;;  %v1349_v22 = vpop.permute.xlu0 %1348  ;;  %v1361_v14 = vsel %vm1360_vm0, %v1358_v13, %v1340_v10  ;;  %v1529_v51 = vld [vmem:[%s5177_s5 + $0x278] sm:$0xff]  ;;  %v3187_v12 = vpack.c.bf16 %v1528_v24, %v1526_v7  ;;  %v1530_v44 = vld [vmem:[%s5177_s5 + $0x280] sm:$0xff]  ;;  %v1532_v20 = vld [vmem:[%s5177_s5 + $0x290] sm:$0xff] }
 0x39d   : > { %v1414_v15 = vsel %vm1360_vm0, %v1412_v37, %v1394_v49  ;;  %v1415_v17 = vsel %vm1360_vm0, %v1413_v60, %v1396_v6  ;;  %v1364_v16 = vsel %vm1363_vm2, %v1361_v14, %v1340_v10  ;;  %v1535_v13 = vld [vmem:[%s5177_s5 + $0x2a8] sm:$0xff]  ;;  %v1537_v37 = vld [vmem:[%s5177_s5 + $0x2b8] sm:$0xff]  ;;  %v3191_v60 = vpack.c.bf16 %v1532_v20, %v1530_v44  ;;  %v1534_v14 = vld [vmem:[%s5177_s5 + $0x2a0] sm:$0xff] }
 0x39e   : > { %v1416_v5 = vsel %vm1363_vm2, %v1414_v15, %v1394_v49  ;;  %v1417_v23 = vsel %vm1363_vm2, %v1415_v17, %v1396_v6  ;;  %v3185_v6 = vpack.c.bf16 %v1529_v51, %v1527_v39  ;;  %v1536_v15 = vld [vmem:[%s5177_s5 + $0x2b0] sm:$0xff]  ;;  %v1539_v17 = vld [vmem:[%s5177_s5 + $0x2c8] sm:$0xff]  ;;  %v2609_v24 = vld [vmem:[%s5181_s9 + $0x58] sm:$0xff] }
 0x39f   : > { %v1428_v27 = vrot.slane %v1416_v5, 2  ;;  %v1429_v28 = vrot.slane %v1417_v23, 2  ;;  %v3195_v5 = vpack.c.bf16 %v1536_v15, %v1534_v14  ;;  %v2608_v7 = vld [vmem:[%s5181_s9 + $0x50] sm:$0xff]  ;;  %v2613_v44 = vld [vmem:[%s5181_s9 + $0x78] sm:$0xff] }
 0x3a0   : > { %v1342_v59 = vpop.permute.xlu0 %1341 }
 0x3a1   : > { %1438 = vrot.lane.b32.xlu0 %v1429_v28, %s5205_s26  ;;  %v1430_v31 = vsel %vm590_vm1, %v1428_v27, %v1429_v28  ;;  %v1356_v32 = vsel %vm1354_vm13, %v4412_v0, %v1342_v59  ;;  %v1370_v0 = vsel %vm1369_vm4, %v1340_v10, %v1349_v22  ;;  %vm1568_vm1 = vcmask 293888   ;;  %v1533_v10 = vld [vmem:[%s5177_s5 + $0x298] sm:$0xff]  ;;  %v1538_v27 = vld [vmem:[%s5177_s5 + $0x2c0] sm:$0xff]  ;;  %v1540_v28 = vld [vmem:[%s5177_s5 + $0x2d0] sm:$0xff] }
 0x3a2   : > { %1434 = vrot.lane.b32.xlu1 %v1430_v31, %s5205_s26  ;;  %v1359_v34 = vsel %vm1357_vm15, %v1356_v32, %v1342_v59  ;;  %v1373_v45 = vsel %vm1372_vm5, %v1370_v0, %v1349_v22  ;;  %v3189_v29 = vpack.c.bf16 %v1533_v10, %v1531_v8  ;;  %v1545_v31 = vld [vmem:[%s5177_s5 + $0x2f8] sm:$0xff]  ;;  %v3199_v32 = vpack.c.bf16 %v1540_v28, %v1538_v27  ;;  %v2610_v10 = vld [vmem:[%s5181_s9 + $0x60] sm:$0xff] }
 0x3a3   : > { %v1362_v38 = vsel %vm1360_vm0, %v1359_v34, %v1342_v59  ;;  %v1376_v46 = vsel %vm1375_vm7, %v1373_v45, %v1349_v22  ;;  %v1546_v45 = vld [vmem:[%s5177_s5 + $0x300] sm:$0xff]  ;;  %v3222_v8 = vpack.c.bf16 %v2609_v24, %v2608_v7  ;;  %vm2352_vm15 = vcmask 982016  }
 0x3a4   : > { %v1365_v40 = vsel %vm1363_vm2, %v1362_v38, %v1342_v59  ;;  %v1379_v52 = vsel %vm1378_vm8, %v1376_v46, %v1349_v22  ;;  %v3193_v22 = vpack.c.bf16 %v1537_v37, %v1535_v13  ;;  %v1544_v38 = vld [vmem:[%s5177_s5 + $0x2f0] sm:$0xff]  ;;  %v2614_v13 = vld [vmem:[%s5181_s9 + $0x80] sm:$0xff]  ;;  %v2615_v37 = vld [vmem:[%s5181_s9 + $0x88] sm:$0xff] }
 0x3a5   : > { %1440 = vrot.lane.b32.xlu0 %v1432_v36, %s5205_s26  ;;  %v1542_v36 = vld [vmem:[%s5177_s5 + $0x2e0] sm:$0xff]  ;;  %v1548_v46 = vld [vmem:[%s5177_s5 + $0x310] sm:$0xff] }
 0x3a6   : > { %1350 = vrot.lane.b32.xlu1 %v4422_v9, %s5206_s21  ;;  %v1516_v9 = vld [vmem:[%s5177_s5 + $0x210] sm:$0xff]  ;;  %v3207_v48 = vpack.c.bf16 %v1548_v46, %v1546_v45  ;;  %v1914_v45 = vld [vmem:[%s5181_s9 + $0x20] sm:$0xff]  ;;  %v1915_v46 = vld [vmem:[%s5181_s9 + $0x28] sm:$0xff]  ;;  %s5130_s21 = scalar_lea.hbm %s5187_s15, %s2656_s23 }
 0x3a7   : > { %v3175_v54 = vpack.c.bf16 %v1516_v9, %v1514_v47  ;;  %v1551_v47 = vld [vmem:[%s5177_s5 + $0x328] sm:$0xff]  ;;  %v1553_v9 = vld [vmem:[%s5177_s5 + $0x338] sm:$0xff]  ;;  %v2624_v24 = vld [vmem:[%s5181_s9 + $0xc0] sm:$0xff] }
 0x3a8   : > { %v3209_v18 = vpack.c.bf16 %v1553_v9, %v1551_v47  ;;  %v3243_v47 = vpack.c.bf16 %v1915_v46, %v1914_v45  ;;  %v1916_v9 = vld [vmem:[%s5181_s9 + $0x30] sm:$0xff]  ;;  %v2650_v45 = vld [vmem:[%s5181_s9 + $0x180] sm:$0xff]  ;;  %v2651_v46 = vld [vmem:[%s5181_s9 + $0x188] sm:$0xff] }
 0x3aa   : > { %1436 = vrot.lane.b32.xlu1 %v1433_v42, %s5205_s26  ;;  %v3203_v42 = vpack.c.bf16 %v1544_v38, %v1542_v36  ;;  %s3612_s26 = smov 48   ;;  %v1911_v36 = vld [vmem:[%s5181_s9 + $0x8] sm:$0xff]  ;;  %v1835_v38 = vld [vmem:[%s5180_s8] sm:$0x1f] }
 0x413   : > { %v4704_v49 = vpop.permute.xlu0 %1438 }
 0x414   : > { %v4672_v50 = vpop.permute.xlu1 %1434 }
 0x415   : > { %v1448_v55 = vsel %vm758_vm6, %v1379_v52, %v4672_v50  ;;  %v1550_v52 = vld [vmem:[%s5177_s5 + $0x320] sm:$0xff] }
 0x416   : > { %1643 = vmatprep.mubr.f32.mxu1 %v1448_v55 }
 0x417   : > { %1644 = vmatmul.mubr.f32.vlgmr.msra.gmra.mrb[4].mxu1 %v1364_v16  ;;  %v1541_v16 = vld [vmem:[%s5177_s5 + $0x2d8] sm:$0xff]  ;;  %v1441_v61 = vpop.permute.xlu0 %1440 }
 0x418   : > { %3176 = vmatpush1.bf16.msra.mxu1 %v3175_v54  ;;  %v1351_v19 = vpop.permute.xlu1 %1350  ;;  %v3197_v23 = vpack.c.bf16 %v1541_v16, %v1539_v17  ;;  %v1552_v54 = vld [vmem:[%s5177_s5 + $0x330] sm:$0xff]  ;;  %v1443_v62 = vsel %vm758_vm6, %v4704_v49, %v1441_v61 }
 0x419   : > { %v1371_v53 = vsel %vm1369_vm4, %v1342_v59, %v1351_v19  ;;  %3178 = vmatprep.subr.bf16.mxu1 %v3177_v21  ;;  %v1543_v59 = vld [vmem:[%s5177_s5 + $0x2e8] sm:$0xff]  ;;  %v3211_v55 = vpack.c.bf16 %v1552_v54, %v1550_v52  ;;  %v1918_v52 = vld [vmem:[%s5181_s9 + $0x40] sm:$0xff] }
 0x41a   : > { %v1374_v35 = vsel %vm1372_vm5, %v1371_v53, %v1351_v19  ;;  %v3201_v34 = vpack.c.bf16 %v1545_v31, %v1543_v59  ;;  %v1555_v21 = vld [vmem:[%s5177_s5 + $0x348] sm:$0xf] }
 0x41b   : > { %v1377_v57 = vsel %vm1375_vm7, %v1374_v35, %v1351_v19  ;;  %v1919_v54 = vld [vmem:[%s5181_s9 + $0x48] sm:$0xff] }
 0x41c   : > { %3180 = vmatpush1.bf16.msra.mxu1 %v3179_v30  ;;  %v1380_v63 = vsel %vm1378_vm8, %v1377_v57, %v1351_v19  ;;  %v1437_v11 = vpop.permute.xlu1 %1436  ;;  %v1556_v19 = vld [vmem:[%s5178_s6] sm:$0x3] }
 0x41d   : > { %v1449_v3 = vsel %vm758_vm6, %v1380_v63, %v4704_v49  ;;  %3182 = vmatprep.subr.bf16.mxu1 %v3181_v25  ;;  %v1442_v58 = vsel %vm758_vm6, %v4672_v50, %v1437_v11  ;;  %v1561_v30 = vrot.slane %v1556_v19, %v919_v2  ;;  %v1565_v50 = vrot.slane %v1556_v19, %v923_v4  ;;  %v2631_v19 = vld [vmem:[%s5181_s9 + $0xf0] sm:$0xff] }
 0x41e   : > { %1649 = vmatprep.mubr.f32.mxu1 %v1449_v3  ;;  %v3609_v63 = vmov 0.0|0.0   ;;  %vm3610_vm6 = vmmov 0  }
 0x41f   : > { %1650 = vmatmul.mubr.f32.gmra.mrb[6].mxu1 %v1365_v40  ;;  %v1547_v40 = vld [vmem:[%s5177_s5 + $0x308] sm:$0xff]  ;;  %3221 = vmatprep.subr.bf16.mxu0 %v3609_v63 }
 0x420   : > { %3184 = vmatpush1.bf16.msra.mxu1 %v3183_v56  ;;  %2602 = vmatprep.mubr.msk.f32.mxu1 %vm1568_vm1, %v1437_v11  ;;  %v3205_v0 = vpack.c.bf16 %v1549_v41, %v1547_v40  ;;  %v2611_v11 = vld [vmem:[%s5181_s9 + $0x68] sm:$0xff]  ;;  %v1912_v41 = vld [vmem:[%s5181_s9 + $0x10] sm:$0xff] }
 0x421   : > { %3186 = vmatprep.subr.bf16.mxu1 %v3185_v6  ;;  %2816 = vmatprep.mubr.msk.f32.mxu0 %vm3610_vm6, %v3611_v26 }
 0x422   : > { %3223 = vmatpush3.bf16.msra.mxu0 %v3222_v8  ;;  %v2625_v8 = vld [vmem:[%s5181_s9 + $0xc8] sm:$0xff] }
 0x423   : > { %3224 = vmatprep.subr.bf16.mxu0 %v3609_v63 }
 0x424   : > { %3188 = vmatpush1.bf16.msra.mxu1 %v3187_v12  ;;  %v3225_v12 = vpack.c.bf16 %v2611_v11, %v2610_v10  ;;  %v2637_v11 = vld [vmem:[%s5181_s9 + $0x120] sm:$0xff] }
 0x425   : > { %3190 = vmatprep.subr.bf16.mxu1 %v3189_v29  ;;  %v2612_v29 = vld [vmem:[%s5181_s9 + $0x70] sm:$0xff] }
 0x426   : > { %3226 = vmatpush3.bf16.msra.mxu0 %v3225_v12  ;;  %v3228_v20 = vpack.c.bf16 %v2613_v44, %v2612_v29  ;;  %v2638_v12 = vld [vmem:[%s5181_s9 + $0x128] sm:$0xff]  ;;  %v3258_v29 = vpack.c.bf16 %v2625_v8, %v2624_v24  ;;  %v2626_v44 = vld [vmem:[%s5181_s9 + $0xd0] sm:$0xff]  ;;  %v2431_v24 = vld [vmem:[%s5185_s13 + $0x20] sm:$0xff] }
 0x427   : > { %3227 = vmatprep.subr.bf16.mxu0 %v3609_v63  ;;  %v2432_v8 = vld [vmem:[%s5185_s13 + $0x28] sm:$0xff] }
 0x428   : > { %3192 = vmatpush1.bf16.msra.mxu1 %v3191_v60  ;;  %v3231_v60 = vpack.c.bf16 %v2615_v37, %v2614_v13  ;;  %v3276_v13 = vpack.c.bf16 %v2638_v12, %v2637_v11  ;;  %v2639_v37 = vld [vmem:[%s5181_s9 + $0x130] sm:$0xff]  ;;  %v2434_v12 = vld [vmem:[%s5185_s13 + $0x38] sm:$0xff] }
 0x429   : > { %3194 = vmatprep.subr.bf16.mxu1 %v3193_v22  ;;  %v2433_v11 = vld [vmem:[%s5185_s13 + $0x30] sm:$0xff] }
 0x42a   : > { %3229 = vmatpush3.bf16.msra.mxu0 %v3228_v20  ;;  %v2627_v20 = vld [vmem:[%s5181_s9 + $0xd8] sm:$0xff] }
 0x42b   : > { %3230 = vmatprep.subr.bf16.mxu0 %v3609_v63 }
 0x42c   : > { %3196 = vmatpush1.bf16.msra.mxu1 %v3195_v5 }
 0x42d   : > { %3198 = vmatprep.subr.bf16.mxu1 %v3197_v23 }
 0x42e   : > { %3232 = vmatpush3.bf16.msra.mxu0 %v3231_v60  ;;  %v2640_v60 = vld [vmem:[%s5181_s9 + $0x138] sm:$0xff] }
 0x42f   : > { %3233 = vmatprep.subr.bf16.mxu0 %v3609_v63 }
 0x430   : > { %3200 = vmatpush1.bf16.msra.mxu1 %v3199_v32  ;;  %v1756_v32 = vld [vmem:[%s5179_s7] sm:$0x1f] }
 0x431   : > { %3202 = vmatprep.subr.bf16.mxu1 %v3201_v34  ;;  %v1910_v34 = vld [vmem:[%s5181_s9] sm:$0xff] }
 0x432   : > { %v3237_v40 = vpack.c.bf16 %v1911_v36, %v1910_v34  ;;  %v2646_v36 = vld [vmem:[%s5181_s9 + $0x160] sm:$0xff] }
 0x434   : > { %3204 = vmatpush1.bf16.msra.mxu1 %v3203_v42  ;;  %v1913_v42 = vld [vmem:[%s5181_s9 + $0x18] sm:$0xff] }
 0x435   : > { %3206 = vmatprep.subr.bf16.mxu1 %v3205_v0  ;;  %v3240_v0 = vpack.c.bf16 %v1913_v42, %v1912_v41  ;;  %v2648_v41 = vld [vmem:[%s5181_s9 + $0x170] sm:$0xff]  ;;  %v2649_v42 = vld [vmem:[%s5181_s9 + $0x178] sm:$0xff] }
 0x438   : > { %3208 = vmatpush1.bf16.msra.mxu1 %v3207_v48  ;;  %v1917_v48 = vld [vmem:[%s5181_s9 + $0x38] sm:$0xff] }
 0x439   : > { %3210 = vmatprep.subr.bf16.mxu1 %v3209_v18  ;;  %v3246_v18 = vpack.c.bf16 %v1917_v48, %v1916_v9  ;;  %v2336_v48 = vld [vmem:[%s5183_s11] sm:$0xff] }
 0x43c   : > { %3212 = vmatpush1.bf16.msra.mxu1 %v3211_v55  ;;  %v3249_v55 = vpack.c.bf16 %v1919_v54, %v1918_v52  ;;  %v2338_v54 = vld [vmem:[%s5183_s11 + $0x10] sm:$0xff] }
 0x43d   : > { %2600 = vmatprep.subr.msk.mxu1 %vm698_vm3, %v1555_v21  ;;  %v2616_v21 = vld [vmem:[%s5181_s9 + $0x90] sm:$0xff] }
 0x440   : > { %2601 = vmatpush1.msk.msra.mxu1 %vm698_vm3, %v1554_v33  ;;  %v2617_v33 = vld [vmem:[%s5181_s9 + $0x98] sm:$0xff] }
 0x441   : > { %1721 = vmatmul.mubr.f32.vlgmr.msra.gmra.mrb[4].mxu1 %v1442_v58  ;;  %3213 = vmatprep.subr.bf16.mxu1 %v3609_v63  ;;  %v3234_v58 = vpack.c.bf16 %v2617_v33, %v2616_v21  ;;  %v2340_v33 = vld [vmem:[%s5183_s11 + $0x20] sm:$0xff] }
 0x442   : > { %2603 = vmatprep.mubr.msk.f32.mxu1 %vm1568_vm1, %v1441_v61 }
 0x443   : > { %3235 = vmatpush3.bf16.msra.mxu0 %v3234_v58  ;;  %v2341_v58 = vld [vmem:[%s5183_s11 + $0x28] sm:$0xff] }
 0x444   : > { %3251 = vmatprep.subr.bf16.mxu0 %v3609_v63 }
 0x445   : > { %1727 = vmatmul.mubr.f32.gmra.mrb[6].mxu1 %v1443_v62 }
 0x446   : > { %2786 = vmatprep.mubr.msk.f32.mxu1 %vm3610_vm6, %v3611_v26 }
 0x514   : > { %v1722_v53 = vpop.f32.mrb[4].mxu1 }
 0x515   : > { %v3340_v25 = vadd.f32 %v1722_v53, %v1561_v30  ;;  %v1724_v1 = vpop.f32.mrb[5].mxu1  ;;  %v2621_v53 = vld [vmem:[%s5181_s9 + $0xa8] sm:$0xff] }
 0x516   : > { %v3341_v43 = vadd.f32 %v1724_v1, %v1565_v50 }
 0x517   : > { %v1733_v35 = vmax.f32 %v3340_v25, 0.0 }
 0x518   : > { %v1734_v39 = vmax.f32 %v3341_v43, 0.0  ;;  %v1728_v51 = vpop.f32.mrb[6].mxu1 }
 0x519   : > { %v3342_v57 = vadd.f32 %v1728_v51, %v1561_v30  ;;  %v1730_v49 = vpop.f32.mrb[7].mxu1  ;;  %v2632_v30 = vld [vmem:[%s5181_s9 + $0xf8] sm:$0xff]  ;;  %v2634_v51 = vld [vmem:[%s5181_s9 + $0x108] sm:$0xff] }
 0x51a   : > { %v3525_v56 = vpack.i.bf16 %v1734_v39, %v1733_v35  ;;  %v3343_v3 = vadd.f32 %v1730_v49, %v1565_v50  ;;  %v2620_v50 = vld [vmem:[%s5181_s9 + $0xa0] sm:$0xff]  ;;  %v3267_v1 = vpack.c.bf16 %v2632_v30, %v2631_v19  ;;  %v2343_v19 = vld [vmem:[%s5183_s11 + $0x38] sm:$0xff] }
 0x51b   : > { %v1735_v2 = vmax.f32 %v3342_v57, 0.0  ;;  %v2633_v39 = vld [vmem:[%s5181_s9 + $0x100] sm:$0xff]  ;;  %v3252_v57 = vpack.c.bf16 %v2621_v53, %v2620_v50  ;;  %v2345_v53 = vld [vmem:[%s5183_s11 + $0x48] sm:$0xff] }
 0x51c   : > { %v1736_v4 = vmax.f32 %v3343_v3, 0.0  ;;  %3526 = vrot.lane.b32.xlu1 %v3525_v56, %s3612_s26  ;;  %v2622_v56 = vld [vmem:[%s5181_s9 + $0xb0] sm:$0xff]  ;;  %v2623_v3 = vld [vmem:[%s5181_s9 + $0xb8] sm:$0xff]  ;;  %v2344_v50 = vld [vmem:[%s5183_s11 + $0x40] sm:$0xff] }
 0x51d   : > { %v3255_v7 = vpack.c.bf16 %v2623_v3, %v2622_v56  ;;  %v2427_v56 = vld [vmem:[%s5185_s13] sm:$0xff]  ;;  %v2428_v3 = vld [vmem:[%s5185_s13 + $0x8] sm:$0xff] }
 0x51e   : > { %v3530_v6 = vpack.i.bf16 %v1736_v4, %v1735_v2  ;;  %v2635_v4 = vld [vmem:[%s5181_s9 + $0x110] sm:$0xff] }
 0x520   : > { %3531 = vrot.lane.b32.xlu0 %v3530_v6, %s3612_s26  ;;  %v2636_v6 = vld [vmem:[%s5181_s9 + $0x118] sm:$0xff] }
 0x521   : > { %v3273_v10 = vpack.c.bf16 %v2636_v6, %v2635_v4  ;;  %v3318_v4 = vpack.c.bf16 %v2428_v3, %v2427_v56  ;;  %v2430_v6 = vld [vmem:[%s5185_s13 + $0x18] sm:$0xff] }
 0x58e   : > { %v3527_v22 = vpop.permute.xlu1 %3526 }
 0x58f   : > { %v3529_v14 = vunpack.i.h.bf16 %v3527_v22  ;;  %v3528_v15 = vunpack.i.l.bf16 %v3527_v22  ;;  %v3261_v22 = vpack.c.bf16 %v2627_v20, %v2626_v44 }
 0x591   : > { %v1750_v16 = vsel %vm1749_vm10, %v3528_v15, %v3529_v14  ;;  %v2628_v14 = vld [vmem:[%s5181_s9 + $0xe0] sm:$0xff]  ;;  %v2629_v15 = vld [vmem:[%s5181_s9 + $0xe8] sm:$0xff] }
 0x592   : > { %v3532_v17 = vpop.permute.xlu0 %3531  ;;  %v1754_v28 = vmax.f32 %v1733_v35, %v1750_v16  ;;  %v3264_v16 = vpack.c.bf16 %v2629_v15, %v2628_v14 }
 0x593   : > { %v3534_v5 = vunpack.i.h.bf16 %v3532_v17  ;;  %v3533_v23 = vunpack.i.l.bf16 %v3532_v17  ;;  %v3279_v17 = vpack.c.bf16 %v2640_v60, %v2639_v37 }
 0x595   : > { %v1751_v27 = vsel %vm1749_vm10, %v3533_v23, %v3534_v5  ;;  %v2642_v5 = vld [vmem:[%s5181_s9 + $0x140] sm:$0xff]  ;;  %v2643_v23 = vld [vmem:[%s5181_s9 + $0x148] sm:$0xff] }
 0x596   : > { %v1755_v59 = vmax.f32 %v1735_v2, %v1751_v27  ;;  %v3270_v2 = vpack.c.bf16 %v2634_v51, %v2633_v39  ;;  %v2348_v39 = vld [vmem:[%s5183_s11 + $0x60] sm:$0xff]  ;;  %v2349_v51 = vld [vmem:[%s5183_s11 + $0x68] sm:$0xff] }
 0x598   : > { %v3214_v31 = vpack.c.bf16 %v1755_v59, %v1754_v28  ;;  %v3282_v28 = vpack.c.bf16 %v2643_v23, %v2642_v5 }
 0x59a   : > { %3216 = vmatpush3.bf16.msk.msra.mxu1 %vm3215_vm12, %v3214_v31 }
 0x59b   : > { %3217 = vmatprep.subr.bf16.mxu1 %v3609_v63 }
 0x59d   : > { %2787 = vmatmul.mubr.msk.f32.vlgmr.msra.gmra.mrb[8].mxu1 %vm1757_vm14, %v1756_v32  ;;  %v2645_v32 = vld [vmem:[%s5181_s9 + $0x158] sm:$0xff] }
 0x59e   : > { %3220 = vmatpush3.bf16.msk.msra.mxu1 %vm3215_vm12, %v3214_v31  ;;  %2793 = vmatprep.mubr.msk.f32.mxu1 %vm3610_vm6, %v3611_v26  ;;  %v2644_v31 = vld [vmem:[%s5181_s9 + $0x150] sm:$0xff] }
 0x59f   : > { %3236 = vmatprep.subr.bf16.mxu1 %v3609_v63  ;;  %v3285_v34 = vpack.c.bf16 %v2645_v32, %v2644_v31  ;;  %v2435_v32 = vld [vmem:[%s5185_s13 + $0x40] sm:$0xff] }
 0x5a1   : > { %2794 = vmatmul.mubr.msk.f32.vlgmr.msra.gmra.mrb[10].mxu1 %vm1757_vm14, %v1835_v38  ;;  %v2647_v38 = vld [vmem:[%s5181_s9 + $0x168] sm:$0xff] }
 0x5a2   : > { %3238 = vmatpush3.bf16.msra.mxu1 %v3237_v40  ;;  %2839 = vmatprep.mubr.msk.f32.mxu1 %vm3610_vm6, %v3611_v26  ;;  %v3288_v40 = vpack.c.bf16 %v2647_v38, %v2646_v36  ;;  %v2437_v38 = vld [vmem:[%s5185_s13 + $0x50] sm:$0xf] }
 0x5a3   : > { %3239 = vmatprep.subr.bf16.mxu1 %v3609_v63 }
 0x5a6   : > { %3241 = vmatpush3.bf16.msra.mxu1 %v3240_v0  ;;  %v3291_v0 = vpack.c.bf16 %v2649_v42, %v2648_v41 }
 0x5a7   : > { %3242 = vmatprep.subr.bf16.mxu1 %v3609_v63 }
 0x5aa   : > { %3244 = vmatpush3.bf16.msra.mxu1 %v3243_v47  ;;  %v3294_v47 = vpack.c.bf16 %v2651_v46, %v2650_v45 }
 0x5ab   : > { %3245 = vmatprep.subr.bf16.mxu1 %v3609_v63 }
 0x5ae   : > { %3247 = vmatpush3.bf16.msra.mxu1 %v3246_v18  ;;  %v2337_v18 = vld [vmem:[%s5183_s11 + $0x8] sm:$0xff] }
 0x5af   : > { %3248 = vmatprep.subr.bf16.mxu1 %v3609_v63  ;;  %v3297_v52 = vpack.c.bf16 %v2337_v18, %v2336_v48 }
 0x5b2   : > { %3250 = vmatpush3.bf16.msra.mxu1 %v3249_v55  ;;  %v2339_v55 = vld [vmem:[%s5183_s11 + $0x18] sm:$0xff] }
 0x5b3   : > { %3266 = vmatprep.subr.bf16.mxu1 %v3609_v63  ;;  %v3300_v21 = vpack.c.bf16 %v2339_v55, %v2338_v54 }
 0x670   : > { %v1831_v61 = vpop.f32.mrb[8].mxu1 }
 0x671   : > { %v2788_v62 = vpop.f32.mrb[9].mxu1 }
 0x672   : > { %v2342_v62 = vld [vmem:[%s5183_s11 + $0x30] sm:$0xff] }
 0x673   : > { %v3306_v30 = vpack.c.bf16 %v2343_v19, %v2342_v62 }
 0x674   : > { %v1905_v25 = vpop.f32.mrb[10].mxu1 }
 0x675   : > { %v4909_v43 = vmax.f32 %v1831_v61, %v1905_v25  ;;  %v2795_v35 = vpop.f32.mrb[11].mxu1  ;;  %v3303_v61 = vpack.c.bf16 %v2341_v58, %v2340_v33  ;;  %v3309_v25 = vpack.c.bf16 %v2345_v53, %v2344_v50 }
 0x677   : > { %v1932_v49 = vrot.slane %v4909_v43, 1  ;;  %2840 = vmatmul.mubr.msk.f32.vlgmr.msra.gmra.mrb[12].mxu1 %vm1933_vm9, %v4909_v43  ;;  %v2174_v27 = vrot.slane %v4909_v43, 3  ;;  %v2089_v59 = vrot.slane %v4909_v43, 2  ;;  %v2259_v9 = vrot.slane %v4909_v43, 4  ;;  %v2347_v43 = vld [vmem:[%s5183_s11 + $0x58] sm:$0xff] }
 0x678   : > { %3268 = vmatpush3.bf16.msra.mxu1 %v3267_v1  ;;  %2885 = vmatprep.mubr.msk.f32.mxu1 %vm3610_vm6, %v3611_v26  ;;  %v2346_v1 = vld [vmem:[%s5183_s11 + $0x50] sm:$0xff] }
 0x679   : > { %2817 = vmatmul.mubr.msk.f32.vlgmr.msra.gmra.mrb[8].mxu0 %vm1933_vm9, %v1932_v49  ;;  %3269 = vmatprep.subr.bf16.mxu1 %v3609_v63  ;;  %v3312_v35 = vpack.c.bf16 %v2347_v43, %v2346_v1  ;;  %v2350_v49 = vld [vmem:[%s5183_s11 + $0x70] sm:$0xff] }
 0x67a   : > { %3253 = vmatpush3.bf16.msra.mxu0 %v3252_v57  ;;  %2862 = vmatprep.mubr.msk.f32.mxu0 %vm3610_vm6, %v3611_v26  ;;  %v3315_v57 = vpack.c.bf16 %v2349_v51, %v2348_v39 }
 0x67b   : > { %3254 = vmatprep.subr.bf16.mxu0 %v3609_v63 }
 0x67c   : > { %3271 = vmatpush3.bf16.msra.mxu1 %v3270_v2  ;;  %v2429_v2 = vld [vmem:[%s5185_s13 + $0x10] sm:$0xff] }
 0x67d   : > { %3272 = vmatprep.subr.bf16.mxu1 %v3609_v63 }
 0x67e   : > { %3256 = vmatpush3.bf16.msra.mxu0 %v3255_v7  ;;  %v3321_v7 = vpack.c.bf16 %v2430_v6, %v2429_v2 }
 0x67f   : > { %3257 = vmatprep.subr.bf16.mxu0 %v3609_v63 }
 0x680   : > { %3274 = vmatpush3.bf16.msra.mxu1 %v3273_v10  ;;  %v3324_v10 = vpack.c.bf16 %v2432_v8, %v2431_v24 }
 0x681   : > { %3275 = vmatprep.subr.bf16.mxu1 %v3609_v63 }
 0x682   : > { %3259 = vmatpush3.bf16.msra.mxu0 %v3258_v29  ;;  %v3327_v29 = vpack.c.bf16 %v2434_v12, %v2433_v11 }
 0x683   : > { %3260 = vmatprep.subr.bf16.mxu0 %v3609_v63 }
 0x684   : > { %3277 = vmatpush3.bf16.msra.mxu1 %v3276_v13 }
 0x685   : > { %3278 = vmatprep.subr.bf16.mxu1 %v3609_v63 }
 0x686   : > { %3262 = vmatpush3.bf16.msra.mxu0 %v3261_v22 }
 0x687   : > { %3263 = vmatprep.subr.bf16.mxu0 %v3609_v63 }
 0x688   : > { %3280 = vmatpush3.bf16.msra.mxu1 %v3279_v17 }
 0x689   : > { %3296 = vmatprep.subr.bf16.mxu1 %v3609_v63 }
 0x68a   : > { %3265 = vmatpush3.bf16.msra.mxu0 %v3264_v16 }
 0x68b   : > { %2886 = vmatmul.mubr.msk.f32.vlgmr.msra.gmra.mrb[14].mxu1 %vm1933_vm9, %v2174_v27  ;;  %3281 = vmatprep.subr.bf16.mxu0 %v3609_v63  ;;  %v2333_v27 = vld [vmem:[%s5182_s10] sm:$0x1] }
 0x68c   : > { %2941 = vmatprep.mubr.msk.f32.mxu1 %vm3610_vm6, %v3611_v26  ;;  %3298 = vmatpush3.bf16.msra.mxu1 %v3297_v52 }
 0x68d   : > { %2863 = vmatmul.mubr.msk.f32.vlgmr.msra.gmra.mrb[10].mxu0 %vm1933_vm9, %v2089_v59  ;;  %3299 = vmatprep.subr.bf16.mxu1 %v3609_v63 }
 0x68e   : > { %3283 = vmatpush3.bf16.msra.mxu0 %v3282_v28  ;;  %2908 = vmatprep.mubr.msk.f32.mxu0 %vm3610_vm6, %v3611_v26 }
 0x68f   : > { %3284 = vmatprep.subr.bf16.mxu0 %v3609_v63 }
 0x690   : > { %3301 = vmatpush3.bf16.msra.mxu1 %v3300_v21 }
 0x691   : > { %3302 = vmatprep.subr.bf16.mxu1 %v3609_v63 }
 0x692   : > { %3286 = vmatpush3.bf16.msra.mxu0 %v3285_v34  ;;  %v2436_v34 = vld [vmem:[%s5185_s13 + $0x48] sm:$0xff] }
 0x693   : > { %3287 = vmatprep.subr.bf16.mxu0 %v3609_v63  ;;  %v3330_v36 = vpack.c.bf16 %v2436_v34, %v2435_v32 }
 0x694   : > { %3304 = vmatpush3.bf16.msra.mxu1 %v3303_v61 }
 0x695   : > { %3305 = vmatprep.subr.bf16.mxu1 %v3609_v63 }
 0x696   : > { %3289 = vmatpush3.bf16.msra.mxu0 %v3288_v40  ;;  %v2351_v40 = vld [vmem:[%s5184_s12] sm:$0x1] }
 0x697   : > { %3290 = vmatprep.subr.bf16.mxu0 %v3609_v63 }
 0x698   : > { %3307 = vmatpush3.bf16.msra.mxu1 %v3306_v30 }
 0x699   : > { %3308 = vmatprep.subr.bf16.mxu1 %v3609_v63 }
 0x69a   : > { %3292 = vmatpush3.bf16.msra.mxu0 %v3291_v0 }
 0x69b   : > { %3293 = vmatprep.subr.bf16.mxu0 %v3609_v63 }
 0x69c   : > { %3310 = vmatpush3.bf16.msra.mxu1 %v3309_v25 }
 0x69d   : > { %3311 = vmatprep.subr.bf16.mxu1 %v3609_v63 }
 0x69e   : > { %3295 = vmatpush3.bf16.msra.mxu0 %v3294_v47 }
 0x69f   : > { %3317 = vmatprep.subr.bf16.mxu0 %v3609_v63 }
 0x6a0   : > { %3313 = vmatpush3.bf16.msra.mxu1 %v3312_v35 }
 0x6a1   : > { %2909 = vmatmul.mubr.msk.f32.vlgmr.msra.gmra.mrb[12].mxu0 %vm1933_vm9, %v2259_v9  ;;  %3314 = vmatprep.subr.bf16.mxu1 %v3609_v63 }
 0x6a2   : > { %2966 = vmatprep.mubr.msk.f32.mxu0 %vm3610_vm6, %v3611_v26  ;;  %3319 = vmatpush3.bf16.msra.mxu0 %v3318_v4 }
 0x6a3   : > { %3320 = vmatprep.subr.bf16.mxu0 %v3609_v63 }
 0x6a4   : > { %3316 = vmatpush3.bf16.msra.mxu1 %v3315_v57 }
 0x6a5   : > { %2939 = vmatprep.subr.mxu1 %v3611_v26 }
 0x6a6   : > { %3322 = vmatpush3.bf16.msra.mxu0 %v3321_v7 }
 0x6a7   : > { %3323 = vmatprep.subr.bf16.mxu0 %v3609_v63 }
 0x6a8   : > { %2940 = vmatpush3.msra.mxu1 %v2350_v49 }
 0x6aa   : > { %3325 = vmatpush3.bf16.msra.mxu0 %v3324_v10 }
 0x6ab   : > { %3326 = vmatprep.subr.bf16.mxu0 %v3609_v63 }
 0x6ae   : > { %3328 = vmatpush3.bf16.msra.mxu0 %v3327_v29 }
 0x6af   : > { %3329 = vmatprep.subr.bf16.mxu0 %v3609_v63 }
 0x6b2   : > { %3331 = vmatpush3.bf16.msra.mxu0 %v3330_v36 }
 0x6b3   : > { %2964 = vmatprep.subr.mxu0 %v3611_v26  ;;  %v2438_v26 = vld [vmem:[%s5186_s14] sm:$0x1] }
 0x6b6   : > { %2965 = vmatpush3.msk.msra.mxu0 %vm698_vm3, %v2437_v38  ;;  %vm2515_vm3 = vcmask 73728  }
 0x74a   : > { %v2074_v44 = vpop.f32.mrb[12].mxu1 }
 0x74b   : > { %v2841_v20 = vpop.f32.mrb[13].mxu1 }
 0x74c   : > { %v2002_v13 = vpop.f32.mrb[8].mxu0 }
 0x74d   : > { %v2075_v37 = vadd.f32 %v2074_v44, %v2002_v13  ;;  %v2818_v60 = vpop.f32.mrb[9].mxu0 }
 0x75e   : > { %v2243_v22 = vpop.f32.mrb[14].mxu1 }
 0x75f   : > { %v2887_v14 = vpop.f32.mrb[15].mxu1 }
 0x760   : > { %v2158_v15 = vpop.f32.mrb[10].mxu0 }
 0x761   : > { %v2162_v17 = vadd.f32 %v2158_v15, %v2075_v37  ;;  %v2864_v16 = vpop.f32.mrb[11].mxu0 }
 0x763   : > { %v2247_v5 = vadd.f32 %v2243_v22, %v2162_v17 }
 0x774   : > { %v2328_v23 = vpop.f32.mrb[12].mxu0 }
 0x775   : > { %v2332_v28 = vadd.f32 %v2328_v23, %v2247_v5  ;;  %v2910_v59 = vpop.f32.mrb[13].mxu0 }
 0x777   : > { %v2334_v31 = vadd.f32 %v2333_v27, %v2332_v28 }
 0x779   : > { %v2335_v63 = vmax.f32 %v2334_v31, 0.0 }
 0x77b   : > { %2942 = vmatmul.mubr.msk.f32.vlgmr.msra.gmra.mrb[16].mxu1 %vm2352_vm15, %v2335_v63 }
 0x84e   : > { %v2422_v41 = vpop.f32.mrb[16].mxu1 }
 0x84f   : > { %v2423_v42 = vadd.f32 %v2422_v41, %v2351_v40  ;;  %v2943_v0 = vpop.f32.mrb[17].mxu1 }
 0x851   : > { %v2426_v45 = vmax.f32 %v2423_v42, 0.0 }
 0x853   : > { %2967 = vmatmul.mubr.msk.f32.vlgmr.msra.gmra.mrb[14].mxu0 %vm1354_vm13, %v2426_v45 }
 0x926   : > { %v2511_v46 = vpop.f32.mrb[14].mxu0 }
 0x927   : > { %v2512_v47 = vadd.f32 %v2511_v46, %v2438_v26  ;;  %v2968_v9 = vpop.f32.mrb[15].mxu0 }
 0x929   : > { %2516 = vst.msk [vmem:[%s486_s17] sm:$0x1] %vm2515_vm3, %v2512_v47 }
 0x92a   : > { %3548 = shalt.err (!%p3545_p3)
}
 0x92b   : > { %s3549_s30 = scalar_lea.hbm %s5130_s21, 16  ;;  %s3553_s17 = scalar_lea.hbm %s5187_s15, 128 }
 0x92c   : > { %p3550_p4 = scmp.ne.s32.totalorder %s5130_s21, %s3549_s30  ;;  %p3554_p9 = scmp.lt.u32.totalorder %s5130_s21, %s5187_s15 }
 0x92d   : > { %p3555_p10 = scmp.lt.u32.totalorder %s3553_s17, %s3549_s30  ;;  %p3557_p12 = scmp.lt.u32.totalorder %s3549_s30, %s5130_s21 }
 0x92e   : > { %p3551_p7 = pnand %p3550_p4, %p3732_p5 }
 0x92f   : > { %p3556_p11 = por %p3555_p10, %p3554_p9 }
 0x930   : > { %p3552_p8 = pneg %p3551_p7 }
 0x931   : > { %p3558_p13 = por %p3557_p12, %p3556_p11 }
 0x933   : > { %p3559_p0 = pnand %p3558_p13, %p3552_p8 }
 0x935   : > { %3562 = shalt.err (!%p3559_p0)
}
 0x936   : > { %3357 = dma.vmem_to_hbm [thread:$0]  (%p3732_p5), %s5132_s29, 16, %s5130_s21, %s2518_s20  }
 0x937 PF: > { %s5207_s18 = sld [smem:[#allocation7_spill]]  ;;  %s5208_s22 = sld [smem:[#allocation5_spill]] }
 0x93d   : > { %p3363_p1 = scmp.ge.s32.totalorder %s5207_s18, 2  ;;  %s2542_s24 = sand.u32 1, %s5208_s22  }
 0x93e   : > { %s2543_s16 = scalar_lea.sflag [#allocation3], %s2542_s24 }
 0x93f   : > { %p3360_p2 = pnand %p3363_p1, %p3736_p6 }
 0x941   : > { %3580 = dma.done.wait (!%p3360_p2), %s2543_s16, 16  }
 0x942   : > { %3582 = vsyncadd (!%p3360_p2), %s2543_s16, 4294967280  ;;  %s5210_s21 = sld [smem:[#allocation8_spill]]  ;;  %s5211_s30 = sld [smem:[#allocation6_spill]] }
 0x943   : > { %s5212_s20 = sld [smem:[#allocation9_spill]]  ;;  %s5213_s18 = smov %s3589_s19 }
 0x948   : > { %p25_p3 = scmp.ge.s32.totalorder %s5210_s21, 10   ;;  %s5214_s19 = smov %s5211_s30 }
 0x94a   :  { %27 = sbr.rel (!%p25_p3) target bundleno = 3 (0x3), region = 119 }
 0x951   :  { %2547 = vsyncpa [#allocation3], 1 }
 0x952   :  { %2549 = vsyncpa [#allocation3 + $0x1], 1 }

</bundles_post_ra>
